<compile_context>
chip_gen: v5e
topology: v5e:2x2
jax: 0.10.0
libtpu: 0.0.40
codegen_flags: <defaults>
</compile_context>

<pallas_src>
import functools
import math
from typing import NamedTuple, Optional

import jax
import jax.numpy as jnp
from jax.experimental import pallas as pl
from jax.experimental.pallas import tpu as pltpu


def _round_up(a: int, b: int) -> int:
    return (a + b - 1) // b * b


def _tpu_info():
    """Best-effort (device_kind, vmem_capacity_bytes); defensive on odd setups."""
    vmem_cap = None
    try:
        vmem_cap = int(pltpu.get_tpu_info().vmem_capacity_bytes)
    except Exception:
        vmem_cap = None
    kind = ""
    try:
        kind = jax.devices()[0].device_kind.lower()
    except Exception:
        pass
    if vmem_cap is None:
        vmem_cap = 64 << 20  # conservative default: v7x per-TC VMEM
    return kind, vmem_cap


def _is_v7(kind: str) -> bool:
    return ("v7" in kind) or ("7x" in kind)


def _default_tiles(kind: str, vmem_cap: int):
    """(tm, th, weight_buffer_count), tuned per TPU generation."""
    if ("v5 lite" in kind) or ("v5e" in kind) or ("v5lite" in kind):
        # v5e ridge ~240 flops/weight-byte: tm=256 is near compute-bound already;
        # smaller th + triple-buffered weights smooths DMA bursts.
        return 256, 256, 3
    if _is_v7(kind) or vmem_cap <= (72 << 20):
        # v7x: only 64 MiB VMEM per TC -- spend bytes on a bigger tm instead of
        # deeper weight buffering.
        return 512, 512, 2
    # v6e-like (128 MiB VMEM, ridge ~650 flops/weight-byte): big tm for
    # arithmetic intensity + a third weight buffer to hide DMA jitter.
    return 1024, 512, 3


class LlamaMLPWeights(NamedTuple):
    """Prepared (init-time) weights for the fused SwiGLU MLP kernel."""
    w12: jax.Array      # (E, 2*Hp): column block k = [W1_k^T | W2_k^T], compute dtype
    c_proj: jax.Array   # (Hp, E):  c_proj^T, zero-padded, compute dtype ((in, out) layout)
    hidden_dim: int     # H (unpadded hidden size)
    th: int             # hidden tile the layout was built for (multiple of 128)


def prepare_llama_mlp_weights(w1, w2, c_proj, *, th: Optional[int] = None,
                              compute_dtype=jnp.bfloat16) -> LlamaMLPWeights:
    """One-time weight preparation (do at model init, NOT per forward call).

    w1, w2 : (H, E)  PyTorch nn.Linear layout (out, in)
    c_proj : (E, H)  PyTorch nn.Linear layout (out, in)

    Casts to compute dtype, zero-pads H -> Hp, pre-transposes to (in, out) layout
    (canonical (K, N) MXU RHS, no in-kernel transpose) and fuses W1/W2 per hidden
    tile into a single RHS slab.  Zero-padded hidden units contribute exactly 0
    (h1 = h2 = 0 AND the padded c_proj rows are 0) -- keep both pads.
    """
    H, E = w1.shape
    assert w2.shape == (H, E) and c_proj.shape == (E, H)

    if th is None:
        kind, vmem_cap = _tpu_info()
        _, th, _ = _default_tiles(kind, vmem_cap)
    th = _round_up(min(th, _round_up(H, 128)), 128)
    Hp = _round_up(H, th)
    nk = Hp // th

    w1p = jnp.pad(w1.astype(compute_dtype), ((0, Hp - H), (0, 0)))   # (Hp, E)
    w2p = jnp.pad(w2.astype(compute_dtype), ((0, Hp - H), (0, 0)))   # (Hp, E)
    # (E, Hp) -> (E, nk, 1, th); interleave per hidden tile -> (E, 2*Hp) where
    # column block k = [W1_k^T (th cols) | W2_k^T (th cols)].
    w1t = w1p.T.reshape(E, nk, 1, th)
    w2t = w2p.T.reshape(E, nk, 1, th)
    w12 = jnp.concatenate([w1t, w2t], axis=2).reshape(E, 2 * Hp)

    cpp = jnp.pad(c_proj.astype(compute_dtype), ((0, 0), (0, Hp - H))).T  # (Hp, E)

    return LlamaMLPWeights(w12=w12, c_proj=cpp, hidden_dim=H, th=th)


def _llama_mlp_kernel(x_ref, w12_ref, cp_ref, o_ref, acc_ref, *, th):
    # x_ref  : (tm, E)     token tile (compute dtype)
    # w12_ref: (E, 2*th)   fused [W1_k^T | W2_k^T] tile, canonical (K, N) RHS
    # cp_ref : (th, E)     c_proj^T tile, canonical (K, N) RHS
    # o_ref  : (tm, E)     output tile (written once, at the last hidden step)
    # acc_ref: (tm, E)     f32 accumulator, resident across the hidden (k) axis
    k = pl.program_id(1)

    @pl.when(k == 0)
    def _():
        acc_ref[...] = jnp.zeros_like(acc_ref)

    # Single fused up-projection on the MXU: (tm, E) @ (E, 2*th) -> (tm, 2*th).
    h = jnp.dot(x_ref[...], w12_ref[...], preferred_element_type=jnp.float32)
    h1 = h[:, :th]          # th is a multiple of 128 -> lane-tile-aligned free slice
    h2 = h[:, th:]
    # SwiGLU gate in f32 (sigmoid goes to the EUP, hidden under the MXU);
    # single cast back to the MXU compute dtype for the down-projection.
    gated = (h1 * jax.nn.sigmoid(h1) * h2).astype(x_ref.dtype)

    # Partial down-projection for this hidden tile, accumulated in f32.
    acc_ref[...] += jnp.dot(gated, cp_ref[...], preferred_element_type=jnp.float32)

    @pl.when(k == pl.num_programs(1) - 1)
    def _():
        o_ref[...] = acc_ref[...].astype(o_ref.dtype)


def _vmem_bytes(tm, th, E, cbytes, obytes, x_buf, w_buf, o_buf):
    return (x_buf * tm * E * cbytes          # x tiles
            + w_buf * (2 * th) * E * cbytes  # fused W1/W2 tiles
            + w_buf * th * E * cbytes        # c_proj tiles
            + o_buf * tm * E * obytes        # output tiles
            + tm * E * 4)                    # f32 accumulator scratch


def _llama_mlp_prepared_impl(x, weights: LlamaMLPWeights, *, tm, use_buffer_hints):
    B, T, E = x.shape
    th = weights.th
    Hp = weights.c_proj.shape[0]
    H = weights.hidden_dim
    assert weights.w12.shape == (E, 2 * Hp)
    assert weights.c_proj.shape == (Hp, E)

    compute_dtype = weights.w12.dtype
    out_dtype = x.dtype
    cbytes = jnp.dtype(compute_dtype).itemsize
    obytes = jnp.dtype(out_dtype).itemsize
    # Minimum sublane pack: 8 rows (32-bit), 16 rows (bf16), 32 rows (8-bit).
    sub_min = 8 * max(1, 4 // cbytes)

    M = B * T
    kind, vmem_cap = _tpu_info()
    tm_def, _, w_buf = _default_tiles(kind, vmem_cap)
    if tm is None:
        tm = tm_def
    tm_eff = _round_up(min(tm, _round_up(M, sub_min)), sub_min)

    x_buf = 1 if use_buffer_hints else 2
    o_buf = 1 if use_buffer_hints else 2
    if not use_buffer_hints:
        w_buf = 2

    vmem_budget = max(vmem_cap - (12 << 20), 24 << 20)
    # Shrink until the working set fits: drop the extra weight buffer first,
    # then halve tm (never th -- the prepared weight layout is tied to it).
    while _vmem_bytes(tm_eff, th, E, cbytes, obytes, x_buf, w_buf, o_buf) > vmem_budget:
        if w_buf > 2:
            w_buf = 2
        elif tm_eff > sub_min:
            tm_eff = _round_up(max(sub_min, tm_eff // 2), sub_min)
        else:
            break

    # v7x megacore: make sure the "parallel" M axis has >= 2 tiles so both
    # TensorCores get work (each streams half the weights; workload is
    # weight-bound at small M anyway).  Skip on 1-TC chips (would just double
    # serial weight re-streaming).
    if _is_v7(kind) and _round_up(M, tm_eff) // tm_eff < 2 and tm_eff >= 2 * sub_min:
        tm_eff = _round_up((tm_eff + 1) // 2, sub_min)

    Mp = _round_up(M, tm_eff)
    grid = (Mp // tm_eff, Hp // th)

    # NOTE: E maps to the lane axis as a full-extent block; non-multiple-of-128 E
    # is still correct (lane-padded in vregs), just slightly wasteful.
    x2d = x.reshape(M, E).astype(compute_dtype)
    if Mp != M:
        x2d = jnp.pad(x2d, ((0, Mp - M), (0, 0)))

    vmem_bytes = _vmem_bytes(tm_eff, th, E, cbytes, obytes, x_buf, w_buf, o_buf)
    vmem_limit = int(min(max(vmem_bytes + (4 << 20), 32 << 20), vmem_budget))
    vmem_limit = max(vmem_limit, vmem_bytes + (2 << 20))
    vmem_limit = int(min(vmem_limit, vmem_cap))

    cost = pl.CostEstimate(
        flops=6 * M * E * H,                 # three (2*M*E*H)-flop matmuls
        transcendentals=M * H,               # sigmoid
        bytes_accessed=(Mp * E * cbytes                       # x (resident across k)
                        + grid[0] * 3 * Hp * E * cbytes       # weights re-streamed per M tile
                        + Mp * E * obytes),                   # output write
    )

    def _spec(shape, imap, buf):
        if buf == 2:
            return pl.BlockSpec(shape, imap)
        return pl.BlockSpec(shape, imap, pipeline_mode=pl.Buffered(buf))

    grid_spec = pltpu.PrefetchScalarGridSpec(
        num_scalar_prefetch=0,
        grid=grid,
        in_specs=[
            _spec((tm_eff, E), lambda i, k: (i, 0), x_buf),   # x: constant along k
            _spec((E, 2 * th), lambda i, k: (0, k), w_buf),   # fused W1/W2 tile
            _spec((th, E), lambda i, k: (k, 0), w_buf),       # c_proj^T tile
        ],
        out_specs=_spec((tm_eff, E), lambda i, k: (i, 0), o_buf),
        scratch_shapes=[pltpu.VMEM((tm_eff, E), jnp.float32)],
    )

    out2d = pl.pallas_call(
        functools.partial(_llama_mlp_kernel, th=th),
        out_shape=jax.ShapeDtypeStruct((Mp, E), out_dtype),
        grid_spec=grid_spec,
        compiler_params=pltpu.CompilerParams(
            dimension_semantics=("parallel", "arbitrary"),
            vmem_limit_bytes=vmem_limit,
        ),
        cost_estimate=cost,
    )(x2d, weights.w12, weights.c_proj)

    return out2d[:M].reshape(B, T, E)


def llama_mlp_prepared(x, weights: LlamaMLPWeights, *, tm: Optional[int] = None,
                       use_buffer_hints: bool = True):
    """Fused SwiGLU MLP forward using init-time prepared weights (hot path)."""
    try:
        return _llama_mlp_prepared_impl(x, weights, tm=tm,
                                        use_buffer_hints=use_buffer_hints)
    except Exception:
        if not use_buffer_hints:
            raise
        # Fallback for JAX builds without BlockSpec pipeline_mode support:
        # plain double-buffered specs (slightly more VMEM, same semantics).
        return _llama_mlp_prepared_impl(x, weights, tm=tm, use_buffer_hints=False)


def llama_mlp(x, w1, w2, c_proj, *, tm: Optional[int] = None,
              th: Optional[int] = None, compute_dtype=jnp.bfloat16):
    """Convenience wrapper:  c_proj(silu(w1(x)) * w2(x)).

    x      : (B, T, E)
    w1, w2 : (H, E)   PyTorch nn.Linear weight layout (out, in)
    c_proj : (E, H)   PyTorch nn.Linear weight layout (out, in)

    In a real model, call prepare_llama_mlp_weights ONCE at init and reuse the
    result across forward calls so the cast/pad/transpose never hits the hot path.
    """
    weights = prepare_llama_mlp_weights(w1, w2, c_proj, th=th,
                                        compute_dtype=compute_dtype)
    return llama_mlp_prepared(x, weights, tm=tm)


def llama_mlp_ref(x, w1, w2, c_proj):
    h1 = x @ w1.T
    h2 = x @ w2.T
    return (jax.nn.silu(h1) * h2) @ c_proj.T


if __name__ == "__main__":
    # Config mirroring LlamaMLP.__init__
    n_embd = 128
    multiple_of = 128
    hidden_dim = 4 * n_embd
    hidden_dim = int(2 * hidden_dim / 3)
    hidden_dim = multiple_of * ((hidden_dim + multiple_of - 1) // multiple_of)  # -> 384

    B, T = 2, 8
    key = jax.random.PRNGKey(0)
    kx, k1, k2, k3 = jax.random.split(key, 4)

    x = jax.random.normal(kx, (B, T, n_embd), dtype=jnp.float32)
    # Deterministic synthetic weights (PyTorch Linear layout: (out, in))
    scale1 = 1.0 / math.sqrt(n_embd)
    scale2 = 1.0 / math.sqrt(hidden_dim)
    w1 = jax.random.uniform(k1, (hidden_dim, n_embd), jnp.float32, -scale1, scale1)
    w2 = jax.random.uniform(k2, (hidden_dim, n_embd), jnp.float32, -scale1, scale1)
    c_proj = jax.random.uniform(k3, (n_embd, hidden_dim), jnp.float32, -scale2, scale2)

    ref = llama_mlp_ref(x, w1, w2, c_proj)

    # f32 MXU path: strict numerical check.  Weights prepared ONCE, reused twice.
    w_prep_f32 = prepare_llama_mlp_weights(w1, w2, c_proj, compute_dtype=jnp.float32)
    out_f32 = llama_mlp_prepared(x, w_prep_f32)
    jax.block_until_ready(out_f32)
    assert out_f32.shape == (B, T, n_embd)
    assert jnp.allclose(out_f32, ref, atol=1e-4, rtol=1e-4)

    out_f32_b = llama_mlp_prepared(x * 0.5, w_prep_f32)   # weight prep off the hot path
    jax.block_until_ready(out_f32_b)
    assert jnp.allclose(out_f32_b, llama_mlp_ref(x * 0.5, w1, w2, c_proj),
                        atol=1e-4, rtol=1e-4)

    # bf16 MXU path (production default): looser tolerance from bf16 rounding.
    out_bf16 = llama_mlp(x, w1, w2, c_proj, compute_dtype=jnp.bfloat16)
    jax.block_until_ready(out_bf16)
    assert out_bf16.shape == (B, T, n_embd)
    assert jnp.allclose(out_bf16, ref, atol=3e-2, rtol=3e-2)

    print("KERNEL_OK")
</pallas_src>

<mosaic_0001>
module attributes {stable_mosaic.version = 11 : i64} {
  func.func @_llama_mlp_kernel(%arg0: i32, %arg1: i32, %arg2: memref<16x128xf32, #tpu.memory_space<vmem>>, %arg3: memref<128x768xf32, #tpu.memory_space<vmem>>, %arg4: memref<384x128xf32, #tpu.memory_space<vmem>>, %arg5: memref<16x128xf32, #tpu.memory_space<vmem>>, %arg6: memref<16x128xf32, #tpu.memory_space<vmem>>) attributes {dimension_semantics = [#tpu.dimension_semantics<parallel>, #tpu.dimension_semantics<arbitrary>], iteration_bounds = array<i64: 1, 1>, scalar_prefetch = 0 : i64, scratch_operands = 1 : i64, tpu.core_type = #tpu.core_type<tc>, window_params = [{pipeline_mode = #tpu.pipeline_mode<synchronous>, transform_indices = @transform_0, window_bounds = array<i64: 16, 128>}, {transform_indices = @transform_1, window_bounds = array<i64: 128, 768>}, {transform_indices = @transform_2, window_bounds = array<i64: 384, 128>}, {pipeline_mode = #tpu.pipeline_mode<synchronous>, transform_indices = @transform_3, window_bounds = array<i64: 16, 128>}]} {
    %c0_i32 = arith.constant 0 : i32
    %0 = arith.cmpi eq, %arg1, %c0_i32 : i32
    %1 = arith.extui %0 : i1 to i32
    %c0_i32_0 = arith.constant 0 : i32
    %2 = arith.cmpi ne, %1, %c0_i32_0 : i32
    scf.if %2 {
      %cst_14 = arith.constant 0.000000e+00 : f32
      %23 = vector.broadcast %cst_14 : f32 to vector<16x128xf32>
      %c0_15 = arith.constant 0 : index
      %c0_16 = arith.constant 0 : index
      %24 = vector.load %arg6[%c0_15, %c0_16] : memref<16x128xf32, #tpu.memory_space<vmem>>, vector<16x128xf32>
      tpu.vector_store %arg6[%c0_15, %c0_16], %23 {strides = array<i32>} : memref<16x128xf32, #tpu.memory_space<vmem>>, vector<16x128xf32>,
    } else {
    }
    %c0 = arith.constant 0 : index
    %c0_1 = arith.constant 0 : index
    %3 = vector.load %arg2[%c0, %c0_1] : memref<16x128xf32, #tpu.memory_space<vmem>>, vector<16x128xf32>
    %c0_2 = arith.constant 0 : index
    %c0_3 = arith.constant 0 : index
    %4 = vector.load %arg3[%c0_2, %c0_3] : memref<128x768xf32, #tpu.memory_space<vmem>>, vector<128x768xf32>
    %cst = arith.constant dense<0.000000e+00> : vector<16x768xf32>
    %5 = tpu.matmul %3, %4, %cst {dimension_numbers = #tpu.dot_dimension_numbers<[1], [0], [0], [1], [0, 0, 1, 1], [], []>} : vector<16x128xf32>, vector<128x768xf32>, vector<16x768xf32> -> vector<16x768xf32>
    %6 = vector.extract_strided_slice %5 {offsets = [0, 0], sizes = [16, 384], strides = [1, 1]} : vector<16x768xf32> to vector<16x384xf32>
    %7 = vector.extract_strided_slice %5 {offsets = [0, 384], sizes = [16, 384], strides = [1, 1]} : vector<16x768xf32> to vector<16x384xf32>
    %8 = arith.negf %6 : vector<16x384xf32>
    %9 = math.exp %8 : vector<16x384xf32>
    %cst_4 = arith.constant 1.000000e+00 : f32
    %10 = vector.broadcast %cst_4 : f32 to vector<16x384xf32>
    %11 = arith.addf %10, %9 : vector<16x384xf32>
    %12 = arith.divf %10, %11 : vector<16x384xf32>
    %13 = arith.mulf %6, %12 : vector<16x384xf32>
    %14 = arith.mulf %13, %7 : vector<16x384xf32>
    %c0_5 = arith.constant 0 : index
    %c0_6 = arith.constant 0 : index
    %15 = vector.load %arg6[%c0_5, %c0_6] : memref<16x128xf32, #tpu.memory_space<vmem>>, vector<16x128xf32>
    %c0_7 = arith.constant 0 : index
    %c0_8 = arith.constant 0 : index
    %16 = vector.load %arg4[%c0_7, %c0_8] : memref<384x128xf32, #tpu.memory_space<vmem>>, vector<384x128xf32>
    %cst_9 = arith.constant dense<0.000000e+00> : vector<16x128xf32>
    %17 = tpu.matmul %14, %16, %cst_9 {dimension_numbers = #tpu.dot_dimension_numbers<[1], [0], [0], [1], [0, 0, 1, 1], [], []>} : vector<16x384xf32>, vector<384x128xf32>, vector<16x128xf32> -> vector<16x128xf32>
    %18 = arith.addf %15, %17 : vector<16x128xf32>
    %c0_10 = arith.constant 0 : index
    %c0_11 = arith.constant 0 : index
    %19 = vector.load %arg6[%c0_10, %c0_11] : memref<16x128xf32, #tpu.memory_space<vmem>>, vector<16x128xf32>
    tpu.vector_store %arg6[%c0_10, %c0_11], %18 {strides = array<i32>} : memref<16x128xf32, #tpu.memory_space<vmem>>, vector<16x128xf32>,
    %c0_i32_12 = arith.constant 0 : i32
    %20 = arith.cmpi eq, %arg1, %c0_i32_12 : i32
    %21 = arith.extui %20 : i1 to i32
    %c0_i32_13 = arith.constant 0 : i32
    %22 = arith.cmpi ne, %21, %c0_i32_13 : i32
    scf.if %22 {
      %c0_14 = arith.constant 0 : index
      %c0_15 = arith.constant 0 : index
      %23 = vector.load %arg6[%c0_14, %c0_15] : memref<16x128xf32, #tpu.memory_space<vmem>>, vector<16x128xf32>
      %c0_16 = arith.constant 0 : index
      %c0_17 = arith.constant 0 : index
      %24 = vector.load %arg5[%c0_16, %c0_17] : memref<16x128xf32, #tpu.memory_space<vmem>>, vector<16x128xf32>
      tpu.vector_store %arg5[%c0_16, %c0_17], %23 {strides = array<i32>} : memref<16x128xf32, #tpu.memory_space<vmem>>, vector<16x128xf32>,
    } else {
    }
    return
  }
  func.func @transform_0(%arg0: i32, %arg1: i32) -> (i32, i32) {
    %c0_i32 = arith.constant 0 : i32
    %c0_i32_0 = arith.constant 0 : i32
    return %arg0, %c0_i32 : i32, i32
  }
  func.func @transform_1(%arg0: i32, %arg1: i32) -> (i32, i32) {
    %c0_i32 = arith.constant 0 : i32
    %c0_i32_0 = arith.constant 0 : i32
    return %c0_i32, %arg1 : i32, i32
  }
  func.func @transform_2(%arg0: i32, %arg1: i32) -> (i32, i32) {
    %c0_i32 = arith.constant 0 : i32
    %c0_i32_0 = arith.constant 0 : i32
    return %arg1, %c0_i32 : i32, i32
  }
  func.func @transform_3(%arg0: i32, %arg1: i32) -> (i32, i32) {
    %c0_i32 = arith.constant 0 : i32
    %c0_i32_0 = arith.constant 0 : i32
    return %arg0, %c0_i32 : i32, i32
  }
}

module attributes {stable_mosaic.version = 11 : i64} {
  func.func @_llama_mlp_kernel(%arg0: i32, %arg1: i32, %arg2: memref<16x128xf32, #tpu.memory_space<vmem>>, %arg3: memref<128x768xf32, #tpu.memory_space<vmem>>, %arg4: memref<384x128xf32, #tpu.memory_space<vmem>>, %arg5: memref<16x128xf32, #tpu.memory_space<vmem>>, %arg6: memref<16x128xf32, #tpu.memory_space<vmem>>) attributes {dimension_semantics = [#tpu.dimension_semantics<parallel>, #tpu.dimension_semantics<arbitrary>], iteration_bounds = array<i64: 1, 1>, scalar_prefetch = 0 : i64, scratch_operands = 1 : i64, tpu.core_type = #tpu.core_type<tc>, window_params = [{transform_indices = @transform_0, window_bounds = array<i64: 16, 128>}, {transform_indices = @transform_1, window_bounds = array<i64: 128, 768>}, {transform_indices = @transform_2, window_bounds = array<i64: 384, 128>}, {transform_indices = @transform_3, window_bounds = array<i64: 16, 128>}]} {
    %c0_i32 = arith.constant 0 : i32
    %0 = arith.cmpi eq, %arg1, %c0_i32 : i32
    %1 = arith.extui %0 : i1 to i32
    %c0_i32_0 = arith.constant 0 : i32
    %2 = arith.cmpi ne, %1, %c0_i32_0 : i32
    scf.if %2 {
      %cst_14 = arith.constant 0.000000e+00 : f32
      %23 = vector.broadcast %cst_14 : f32 to vector<16x128xf32>
      %c0_15 = arith.constant 0 : index
      %c0_16 = arith.constant 0 : index
      %24 = vector.load %arg6[%c0_15, %c0_16] : memref<16x128xf32, #tpu.memory_space<vmem>>, vector<16x128xf32>
      tpu.vector_store %arg6[%c0_15, %c0_16], %23 {strides = array<i32>} : memref<16x128xf32, #tpu.memory_space<vmem>>, vector<16x128xf32>,
    } else {
    }
    %c0 = arith.constant 0 : index
    %c0_1 = arith.constant 0 : index
    %3 = vector.load %arg2[%c0, %c0_1] : memref<16x128xf32, #tpu.memory_space<vmem>>, vector<16x128xf32>
    %c0_2 = arith.constant 0 : index
    %c0_3 = arith.constant 0 : index
    %4 = vector.load %arg3[%c0_2, %c0_3] : memref<128x768xf32, #tpu.memory_space<vmem>>, vector<128x768xf32>
    %cst = arith.constant dense<0.000000e+00> : vector<16x768xf32>
    %5 = tpu.matmul %3, %4, %cst {dimension_numbers = #tpu.dot_dimension_numbers<[1], [0], [0], [1], [0, 0, 1, 1], [], []>} : vector<16x128xf32>, vector<128x768xf32>, vector<16x768xf32> -> vector<16x768xf32>
    %6 = vector.extract_strided_slice %5 {offsets = [0, 0], sizes = [16, 384], strides = [1, 1]} : vector<16x768xf32> to vector<16x384xf32>
    %7 = vector.extract_strided_slice %5 {offsets = [0, 384], sizes = [16, 384], strides = [1, 1]} : vector<16x768xf32> to vector<16x384xf32>
    %8 = arith.negf %6 : vector<16x384xf32>
    %9 = math.exp %8 : vector<16x384xf32>
    %cst_4 = arith.constant 1.000000e+00 : f32
    %10 = vector.broadcast %cst_4 : f32 to vector<16x384xf32>
    %11 = arith.addf %10, %9 : vector<16x384xf32>
    %12 = arith.divf %10, %11 : vector<16x384xf32>
    %13 = arith.mulf %6, %12 : vector<16x384xf32>
    %14 = arith.mulf %13, %7 : vector<16x384xf32>
    %c0_5 = arith.constant 0 : index
    %c0_6 = arith.constant 0 : index
    %15 = vector.load %arg6[%c0_5, %c0_6] : memref<16x128xf32, #tpu.memory_space<vmem>>, vector<16x128xf32>
    %c0_7 = arith.constant 0 : index
    %c0_8 = arith.constant 0 : index
    %16 = vector.load %arg4[%c0_7, %c0_8] : memref<384x128xf32, #tpu.memory_space<vmem>>, vector<384x128xf32>
    %cst_9 = arith.constant dense<0.000000e+00> : vector<16x128xf32>
    %17 = tpu.matmul %14, %16, %cst_9 {dimension_numbers = #tpu.dot_dimension_numbers<[1], [0], [0], [1], [0, 0, 1, 1], [], []>} : vector<16x384xf32>, vector<384x128xf32>, vector<16x128xf32> -> vector<16x128xf32>
    %18 = arith.addf %15, %17 : vector<16x128xf32>
    %c0_10 = arith.constant 0 : index
    %c0_11 = arith.constant 0 : index
    %19 = vector.load %arg6[%c0_10, %c0_11] : memref<16x128xf32, #tpu.memory_space<vmem>>, vector<16x128xf32>
    tpu.vector_store %arg6[%c0_10, %c0_11], %18 {strides = array<i32>} : memref<16x128xf32, #tpu.memory_space<vmem>>, vector<16x128xf32>,
    %c0_i32_12 = arith.constant 0 : i32
    %20 = arith.cmpi eq, %arg1, %c0_i32_12 : i32
    %21 = arith.extui %20 : i1 to i32
    %c0_i32_13 = arith.constant 0 : i32
    %22 = arith.cmpi ne, %21, %c0_i32_13 : i32
    scf.if %22 {
      %c0_14 = arith.constant 0 : index
      %c0_15 = arith.constant 0 : index
      %23 = vector.load %arg6[%c0_14, %c0_15] : memref<16x128xf32, #tpu.memory_space<vmem>>, vector<16x128xf32>
      %c0_16 = arith.constant 0 : index
      %c0_17 = arith.constant 0 : index
      %24 = vector.load %arg5[%c0_16, %c0_17] : memref<16x128xf32, #tpu.memory_space<vmem>>, vector<16x128xf32>
      tpu.vector_store %arg5[%c0_16, %c0_17], %23 {strides = array<i32>} : memref<16x128xf32, #tpu.memory_space<vmem>>, vector<16x128xf32>,
    } else {
    }
    return
  }
  func.func @transform_0(%arg0: i32, %arg1: i32) -> (i32, i32) {
    %c0_i32 = arith.constant 0 : i32
    %c0_i32_0 = arith.constant 0 : i32
    return %arg0, %c0_i32 : i32, i32
  }
  func.func @transform_1(%arg0: i32, %arg1: i32) -> (i32, i32) {
    %c0_i32 = arith.constant 0 : i32
    %c0_i32_0 = arith.constant 0 : i32
    return %c0_i32, %arg1 : i32, i32
  }
  func.func @transform_2(%arg0: i32, %arg1: i32) -> (i32, i32) {
    %c0_i32 = arith.constant 0 : i32
    %c0_i32_0 = arith.constant 0 : i32
    return %arg1, %c0_i32 : i32, i32
  }
  func.func @transform_3(%arg0: i32, %arg1: i32) -> (i32, i32) {
    %c0_i32 = arith.constant 0 : i32
    %c0_i32_0 = arith.constant 0 : i32
    return %arg0, %c0_i32 : i32, i32
  }
}

</mosaic_0001>

<bundles_post_ra>
// kernel: tpu_custom_call.1
= control target key start
LH: loop header
LB: loop body
LE: loop exit
PB: predicated region body
PF: predicated region fallthrough
CT: control target
= control target key end

     0   :  { %8 = vsyncpa [#allocation4], 0  ;;  %s853_s0 = inlined_call_operand.hbm [shape: f32[16,128], index: 0, kind: input, shape index: {}]   ;;  %s854_s1 = inlined_call_operand.hbm [shape: f32[128,768], index: 1, kind: input, shape index: {}]   ;;  %s855_s2 = inlined_call_operand.hbm [shape: f32[384,128], index: 2, kind: input, shape index: {}]   ;;  %s856_s3 = inlined_call_operand.hbm [shape: f32[16,128], index: 3, kind: output, shape index: {}]  }
   0x1   :  { %9 = vsyncpa [#allocation7], 0  ;;  %s28_s14 = sshll.u32 %s854_s1, 4  ;;  %s29_s14 = int_to_ptr.hbm [resolvable:$true] %s28_s14 }
   0x2   :  { %10 = vsyncpa [#allocation5], 0  ;;  %s736_s15 = smov [#allocation6]   ;;  %s15_s19 = sshll.u32 %s853_s0, 4  ;;  %s16_s19 = int_to_ptr.hbm [resolvable:$true] %s15_s19 }
   0x3   :  { %s30_s16 = sshll.u32 %s736_s15, 4  ;;  %s737_s20 = smov 768   ;;  %s31_s16 = int_to_ptr.vmem [resolvable:$true] %s30_s16 }
   0x4   :  { %s738_s21 = smov 48   ;;  %s739_s22 = smov [#allocation3]  }
   0x5   :  { %36 = dma.hbm_to_vmem [thread:$0]  %s29_s14, 12288, %s31_s16, [#allocation7], %s737_s20, %s737_s20, %s738_s21  }
   0x6   :  { %s17_s23 = sshll.u32 %s739_s22, 4  ;;  %s740_s24 = smov 128   ;;  %s18_s23 = int_to_ptr.vmem [resolvable:$true] %s17_s23 }
   0x7   :  { %s741_s25 = smov 8   ;;  %s41_s27 = sshll.u32 %s855_s2, 4  ;;  %s42_s27 = int_to_ptr.hbm [resolvable:$true] %s41_s27 }
   0x8   :  { %23 = dma.hbm_to_vmem [thread:$0]  %s16_s19, 256, %s18_s23, [#allocation4], %s740_s24, %s740_s24, %s741_s25  }
   0x9   :  { %s742_s28 = smov [#allocation8]  }
   0xa   :  { %s43_s0 = sshll.u32 %s742_s28, 4  ;;  %s44_s0 = int_to_ptr.vmem [resolvable:$true] %s43_s0 }
   0xb   :  { %49 = dma.hbm_to_vmem [thread:$0]  %s42_s27, 6144, %s44_s0, [#allocation7], %s740_s24, %s740_s24, %s741_s25  }
   0xc   :  { %730 = dma.done.wait [#allocation4], 256  }
   0xd   :  { %731 = vsyncadd [#allocation4], 4294967040 }
   0xe   :  { %732 = dma.done.wait [#allocation7], 18432  }
   0xf   :  { %733 = vsyncadd [#allocation7], 4294948864  ;;  %v160_v0 = vld [vmem:[#allocation6 + $0x2d0] sm:$0xff]  ;;  %v161_v1 = vld [vmem:[#allocation6 + $0x2d8] sm:$0xff]  ;;  %s743_s2 = smov [#allocation9]   ;;  %s566_s5 = sshll.u32 %s856_s3, 4  ;;  %s567_s5 = int_to_ptr.hbm [resolvable:$true] %s566_s5 }
  0x10   :  { %v162_v2 = vld [vmem:[#allocation6 + $0x2e0] sm:$0xff]  ;;  %166 = vmatpush.msra.mxu0 %v160_v0  ;;  %189 = vmatpush.msra.mxu1 %v161_v1  ;;  %v155_v4 = vld [vmem:[#allocation6 + $0x2a8] sm:$0xff]  ;;  %v156_v5 = vld [vmem:[#allocation6 + $0x2b0] sm:$0xff]  ;;  %s564_s29 = sshll.u32 %s743_s2, 4  ;;  %s565_s29 = int_to_ptr.vmem [resolvable:$true] %s564_s29 }
  0x11   :  { %v154_v3 = vld [vmem:[#allocation6 + $0x2a0] sm:$0xff]  ;;  %212 = vmatpush.msra.mxu2 %v162_v2  ;;  %v148_v6 = vld [vmem:[#allocation6 + $0x270] sm:$0xff]  ;;  %v149_v7 = vld [vmem:[#allocation6 + $0x278] sm:$0xff] }
  0x12   :  { %167 = vmatpush.msra.mxu0 %v154_v3  ;;  %190 = vmatpush.msra.mxu1 %v155_v4  ;;  %v150_v8 = vld [vmem:[#allocation6 + $0x280] sm:$0xff]  ;;  %v143_v10 = vld [vmem:[#allocation6 + $0x248] sm:$0xff]  ;;  %v144_v11 = vld [vmem:[#allocation6 + $0x250] sm:$0xff] }
  0x13   :  { %213 = vmatpush.msra.mxu2 %v156_v5  ;;  %v142_v9 = vld [vmem:[#allocation6 + $0x240] sm:$0xff]  ;;  %v136_v12 = vld [vmem:[#allocation6 + $0x210] sm:$0xff]  ;;  %v137_v13 = vld [vmem:[#allocation6 + $0x218] sm:$0xff] }
  0x14   :  { %168 = vmatpush.msra.mxu0 %v148_v6  ;;  %191 = vmatpush.msra.mxu1 %v149_v7  ;;  %v138_v14 = vld [vmem:[#allocation6 + $0x220] sm:$0xff]  ;;  %v131_v16 = vld [vmem:[#allocation6 + $0x1e8] sm:$0xff]  ;;  %v132_v17 = vld [vmem:[#allocation6 + $0x1f0] sm:$0xff] }
  0x15   :  { %214 = vmatpush.msra.mxu2 %v150_v8  ;;  %v130_v15 = vld [vmem:[#allocation6 + $0x1e0] sm:$0xff]  ;;  %v124_v18 = vld [vmem:[#allocation6 + $0x1b0] sm:$0xff]  ;;  %v125_v19 = vld [vmem:[#allocation6 + $0x1b8] sm:$0xff] }
  0x16   :  { %169 = vmatpush.msra.mxu0 %v142_v9  ;;  %192 = vmatpush.msra.mxu1 %v143_v10  ;;  %v126_v20 = vld [vmem:[#allocation6 + $0x1c0] sm:$0xff]  ;;  %v119_v22 = vld [vmem:[#allocation6 + $0x188] sm:$0xff]  ;;  %v120_v23 = vld [vmem:[#allocation6 + $0x190] sm:$0xff] }
  0x17   :  { %215 = vmatpush.msra.mxu2 %v144_v11  ;;  %v118_v21 = vld [vmem:[#allocation6 + $0x180] sm:$0xff]  ;;  %v163_v24 = vld [vmem:[#allocation6 + $0x2e8] sm:$0xff]  ;;  %v112_v25 = vld [vmem:[#allocation6 + $0x150] sm:$0xff] }
  0x18   :  { %170 = vmatpush.msra.mxu0 %v136_v12  ;;  %193 = vmatpush.msra.mxu1 %v137_v13  ;;  %v113_v26 = vld [vmem:[#allocation6 + $0x158] sm:$0xff]  ;;  %v114_v28 = vld [vmem:[#allocation6 + $0x160] sm:$0xff]  ;;  %v151_v29 = vld [vmem:[#allocation6 + $0x288] sm:$0xff] }
  0x19   :  { %216 = vmatpush.msra.mxu2 %v138_v14  ;;  %235 = vmatpush.msra.mxu3 %v163_v24  ;;  %v157_v27 = vld [vmem:[#allocation6 + $0x2b8] sm:$0xff]  ;;  %v106_v30 = vld [vmem:[#allocation6 + $0x120] sm:$0xff]  ;;  %v107_v31 = vld [vmem:[#allocation6 + $0x128] sm:$0xff] }
  0x1a   :  { %171 = vmatpush.msra.mxu0 %v130_v15  ;;  %194 = vmatpush.msra.mxu1 %v131_v16  ;;  %v108_v32 = vld [vmem:[#allocation6 + $0x130] sm:$0xff]  ;;  %v145_v33 = vld [vmem:[#allocation6 + $0x258] sm:$0xff]  ;;  %v102_v36 = vld [vmem:[#allocation6 + $0x100] sm:$0xff] }
  0x1b   :  { %217 = vmatpush.msra.mxu2 %v132_v17  ;;  %236 = vmatpush.msra.mxu3 %v157_v27  ;;  %v100_v34 = vld [vmem:[#allocation6 + $0xf0] sm:$0xff]  ;;  %v101_v35 = vld [vmem:[#allocation6 + $0xf8] sm:$0xff]  ;;  %v139_v37 = vld [vmem:[#allocation6 + $0x228] sm:$0xff] }
  0x1c   :  { %172 = vmatpush.msra.mxu0 %v124_v18  ;;  %195 = vmatpush.msra.mxu1 %v125_v19  ;;  %v94_v38 = vld [vmem:[#allocation6 + $0xc0] sm:$0xff]  ;;  %v95_v39 = vld [vmem:[#allocation6 + $0xc8] sm:$0xff]  ;;  %v96_v40 = vld [vmem:[#allocation6 + $0xd0] sm:$0xff] }
  0x1d   :  { %218 = vmatpush.msra.mxu2 %v126_v20  ;;  %237 = vmatpush.msra.mxu3 %v151_v29  ;;  %v133_v41 = vld [vmem:[#allocation6 + $0x1f8] sm:$0xff]  ;;  %v88_v42 = vld [vmem:[#allocation6 + $0x90] sm:$0xff]  ;;  %v90_v44 = vld [vmem:[#allocation6 + $0xa0] sm:$0xff] }
  0x1e   :  { %173 = vmatpush.msra.mxu0 %v118_v21  ;;  %196 = vmatpush.msra.mxu1 %v119_v22  ;;  %v89_v43 = vld [vmem:[#allocation6 + $0x98] sm:$0xff]  ;;  %v127_v45 = vld [vmem:[#allocation6 + $0x1c8] sm:$0xff]  ;;  %v82_v46 = vld [vmem:[#allocation6 + $0x60] sm:$0xff] }
  0x1f   :  { %219 = vmatpush.msra.mxu2 %v120_v23  ;;  %238 = vmatpush.msra.mxu3 %v145_v33  ;;  %v83_v47 = vld [vmem:[#allocation6 + $0x68] sm:$0xff]  ;;  %v84_v48 = vld [vmem:[#allocation6 + $0x70] sm:$0xff]  ;;  %v121_v49 = vld [vmem:[#allocation6 + $0x198] sm:$0xff] }
  0x20   :  { %174 = vmatpush.msra.mxu0 %v112_v25  ;;  %197 = vmatpush.msra.mxu1 %v113_v26  ;;  %v76_v50 = vld [vmem:[#allocation6 + $0x30] sm:$0xff]  ;;  %v77_v51 = vld [vmem:[#allocation6 + $0x38] sm:$0xff]  ;;  %v78_v52 = vld [vmem:[#allocation6 + $0x40] sm:$0xff] }
  0x21   :  { %220 = vmatpush.msra.mxu2 %v114_v28  ;;  %239 = vmatpush.msra.mxu3 %v139_v37  ;;  %v115_v53 = vld [vmem:[#allocation6 + $0x168] sm:$0xff]  ;;  %v70_v54 = vld [vmem:[#allocation6] sm:$0xff]  ;;  %v72_v56 = vld [vmem:[#allocation6 + $0x10] sm:$0xff] }
  0x22   :  { %175 = vmatpush.msra.mxu0 %v106_v30  ;;  %198 = vmatpush.msra.mxu1 %v107_v31  ;;  %v71_v55 = vld [vmem:[#allocation6 + $0x8] sm:$0xff]  ;;  %v779_v57 = vld [vmem:[#allocation3] sm:$0xff]  ;;  %v165_v59 = vld [vmem:[#allocation6 + $0x2f8] sm:$0xff] }
  0x23   :  { %221 = vmatpush.msra.mxu2 %v108_v32  ;;  %240 = vmatpush.msra.mxu3 %v133_v41  ;;  %v164_v58 = vld [vmem:[#allocation6 + $0x2f0] sm:$0xff]  ;;  %v109_v60 = vld [vmem:[#allocation6 + $0x138] sm:$0xff]  ;;  %v158_v61 = vld [vmem:[#allocation6 + $0x2c0] sm:$0xff] }
  0x24   :  { %176 = vmatpush.msra.mxu0 %v100_v34  ;;  %199 = vmatpush.msra.mxu1 %v101_v35  ;;  %v159_v62 = vld [vmem:[#allocation6 + $0x2c8] sm:$0xff]  ;;  %v152_v0 = vld [vmem:[#allocation6 + $0x290] sm:$0xff]  ;;  %v153_v1 = vld [vmem:[#allocation6 + $0x298] sm:$0xff] }
  0x25   :  { %222 = vmatpush.msra.mxu2 %v102_v36  ;;  %241 = vmatpush.msra.mxu3 %v127_v45  ;;  %v103_v63 = vld [vmem:[#allocation6 + $0x108] sm:$0xff]  ;;  %v97_v2 = vld [vmem:[#allocation6 + $0xd8] sm:$0xff]  ;;  %v146_v3 = vld [vmem:[#allocation6 + $0x260] sm:$0xff] }
  0x26   :  { %177 = vmatpush.msra.mxu0 %v94_v38  ;;  %200 = vmatpush.msra.mxu1 %v95_v39  ;;  %v147_v4 = vld [vmem:[#allocation6 + $0x268] sm:$0xff]  ;;  %v784_v5 = vld [vmem:[#allocation3 + $0x8] sm:$0xff]  ;;  %v140_v6 = vld [vmem:[#allocation6 + $0x230] sm:$0xff] }
  0x27   :  { %223 = vmatpush.msra.mxu2 %v96_v40  ;;  %242 = vmatpush.msra.mxu3 %v121_v49  ;;  %v141_v7 = vld [vmem:[#allocation6 + $0x238] sm:$0xff]  ;;  %v91_v8 = vld [vmem:[#allocation6 + $0xa8] sm:$0xff]  ;;  %v134_v9 = vld [vmem:[#allocation6 + $0x200] sm:$0xff] }
  0x28   :  { %178 = vmatpush.msra.mxu0 %v88_v42  ;;  %201 = vmatpush.msra.mxu1 %v89_v43  ;;  %v135_v10 = vld [vmem:[#allocation6 + $0x208] sm:$0xff]  ;;  %v85_v11 = vld [vmem:[#allocation6 + $0x78] sm:$0xff]  ;;  %v128_v12 = vld [vmem:[#allocation6 + $0x1d0] sm:$0xff] }
  0x29   :  { %224 = vmatpush.msra.mxu2 %v90_v44  ;;  %243 = vmatpush.msra.mxu3 %v115_v53  ;;  %v129_v13 = vld [vmem:[#allocation6 + $0x1d8] sm:$0xff]  ;;  %v79_v14 = vld [vmem:[#allocation6 + $0x48] sm:$0xff]  ;;  %v122_v15 = vld [vmem:[#allocation6 + $0x1a0] sm:$0xff] }
  0x2a   :  { %179 = vmatpush.msra.mxu0 %v82_v46  ;;  %202 = vmatpush.msra.mxu1 %v83_v47  ;;  %v123_v16 = vld [vmem:[#allocation6 + $0x1a8] sm:$0xff]  ;;  %v73_v17 = vld [vmem:[#allocation6 + $0x18] sm:$0xff]  ;;  %v116_v18 = vld [vmem:[#allocation6 + $0x170] sm:$0xff] }
  0x2b   :  { %225 = vmatpush.msra.mxu2 %v84_v48  ;;  %244 = vmatpush.msra.mxu3 %v109_v60  ;;  %v117_v19 = vld [vmem:[#allocation6 + $0x178] sm:$0xff]  ;;  %v110_v20 = vld [vmem:[#allocation6 + $0x140] sm:$0xff]  ;;  %v111_v21 = vld [vmem:[#allocation6 + $0x148] sm:$0xff] }
  0x2c   :  { %180 = vmatpush.msra.mxu0 %v76_v50  ;;  %203 = vmatpush.msra.mxu1 %v77_v51  ;;  %v104_v22 = vld [vmem:[#allocation6 + $0x110] sm:$0xff]  ;;  %v105_v23 = vld [vmem:[#allocation6 + $0x118] sm:$0xff]  ;;  %v98_v24 = vld [vmem:[#allocation6 + $0xe0] sm:$0xff] }
  0x2d   :  { %226 = vmatpush.msra.mxu2 %v78_v52  ;;  %245 = vmatpush.msra.mxu3 %v103_v63  ;;  %v99_v25 = vld [vmem:[#allocation6 + $0xe8] sm:$0xff]  ;;  %v92_v26 = vld [vmem:[#allocation6 + $0xb0] sm:$0xff]  ;;  %v93_v27 = vld [vmem:[#allocation6 + $0xb8] sm:$0xff] }
  0x2e   :  { %181 = vmatpush.msra.mxu0 %v70_v54  ;;  %204 = vmatpush.msra.mxu1 %v71_v55  ;;  %v86_v28 = vld [vmem:[#allocation6 + $0x80] sm:$0xff]  ;;  %v87_v29 = vld [vmem:[#allocation6 + $0x88] sm:$0xff]  ;;  %v80_v30 = vld [vmem:[#allocation6 + $0x50] sm:$0xff] }
  0x2f   :  { %227 = vmatpush.msra.mxu2 %v72_v56  ;;  %182 = vmatmul.f32.vlgmr.msra.gmra.mxu0 %v779_v57  ;;  %v81_v31 = vld [vmem:[#allocation6 + $0x58] sm:$0xff]  ;;  %v74_v32 = vld [vmem:[#allocation6 + $0x20] sm:$0xff]  ;;  %v75_v33 = vld [vmem:[#allocation6 + $0x28] sm:$0xff] }
  0x30   :  { %205 = vmatmul.f32.vlgmr.msra.gmra.mxu1 %v779_v57  ;;  %228 = vmatmul.f32.vlgmr.msra.gmra.mxu2 %v779_v57  ;;  %v447_v34 = vld [vmem:[#allocation8 + $0x78] sm:$0xff]  ;;  %v446_v36 = vld [vmem:[#allocation8 + $0x70] sm:$0xff]  ;;  %v445_v38 = vld [vmem:[#allocation8 + $0x68] sm:$0xff] }
  0x31   :  { %258 = vmatpush.msrb.mxu0 %v164_v58  ;;  %281 = vmatpush.msrb.mxu1 %v165_v59  ;;  %v463_v35 = vld [vmem:[#allocation8 + $0xf8] sm:$0xff]  ;;  %v462_v37 = vld [vmem:[#allocation8 + $0xf0] sm:$0xff]  ;;  %v461_v39 = vld [vmem:[#allocation8 + $0xe8] sm:$0xff] }
  0x32   :  { %246 = vmatpush.msra.mxu3 %v97_v2  ;;  %480 = vmatpush.msrb.mxu2 %v447_v34  ;;  %v444_v40 = vld [vmem:[#allocation8 + $0x60] sm:$0xff]  ;;  %v479_v41 = vld [vmem:[#allocation8 + $0x178] sm:$0xff]  ;;  %v478_v44 = vld [vmem:[#allocation8 + $0x170] sm:$0xff] }
  0x33   :  { %259 = vmatpush.msrb.mxu0 %v158_v61  ;;  %282 = vmatpush.msrb.mxu1 %v159_v62  ;;  %v460_v42 = vld [vmem:[#allocation8 + $0xe0] sm:$0xff]  ;;  %v443_v43 = vld [vmem:[#allocation8 + $0x58] sm:$0xff]  ;;  %v442_v46 = vld [vmem:[#allocation8 + $0x50] sm:$0xff] }
  0x34   :  { %247 = vmatpush.msra.mxu3 %v91_v8  ;;  %481 = vmatpush.msrb.mxu2 %v446_v36  ;;  %v459_v45 = vld [vmem:[#allocation8 + $0xd8] sm:$0xff]  ;;  %v477_v47 = vld [vmem:[#allocation8 + $0x168] sm:$0xff]  ;;  %v458_v48 = vld [vmem:[#allocation8 + $0xd0] sm:$0xff] }
  0x35   :  { %260 = vmatpush.msrb.mxu0 %v152_v0  ;;  %283 = vmatpush.msrb.mxu1 %v153_v1  ;;  %v441_v49 = vld [vmem:[#allocation8 + $0x48] sm:$0xff]  ;;  %v476_v50 = vld [vmem:[#allocation8 + $0x160] sm:$0xff]  ;;  %v475_v53 = vld [vmem:[#allocation8 + $0x158] sm:$0xff] }
  0x36   :  { %248 = vmatpush.msra.mxu3 %v85_v11  ;;  %482 = vmatpush.msrb.mxu2 %v445_v38  ;;  %v457_v51 = vld [vmem:[#allocation8 + $0xc8] sm:$0xff]  ;;  %v440_v52 = vld [vmem:[#allocation8 + $0x40] sm:$0xff]  ;;  %v439_v55 = vld [vmem:[#allocation8 + $0x38] sm:$0xff] }
  0x37   :  { %261 = vmatpush.msrb.mxu0 %v146_v3  ;;  %284 = vmatpush.msrb.mxu1 %v147_v4  ;;  %v456_v54 = vld [vmem:[#allocation8 + $0xc0] sm:$0xff]  ;;  %v474_v56 = vld [vmem:[#allocation8 + $0x150] sm:$0xff]  ;;  %v473_v59 = vld [vmem:[#allocation8 + $0x148] sm:$0xff] }
  0x38   :  { %185 = vmatmul.f32.gmra.mxu0 %v784_v5  ;;  %208 = vmatmul.f32.gmra.mxu1 %v784_v5  ;;  %v438_v58 = vld [vmem:[#allocation8 + $0x30] sm:$0xff]  ;;  %v437_v61 = vld [vmem:[#allocation8 + $0x28] sm:$0xff]  ;;  %v472_v62 = vld [vmem:[#allocation8 + $0x140] sm:$0xff] }
  0x39   :  { %231 = vmatmul.f32.gmra.mxu2 %v784_v5  ;;  %262 = vmatpush.msrb.mxu0 %v140_v6  ;;  %v454_v60 = vld [vmem:[#allocation8 + $0xb0] sm:$0xff]  ;;  %v453_v63 = vld [vmem:[#allocation8 + $0xa8] sm:$0xff]  ;;  %v436_v0 = vld [vmem:[#allocation8 + $0x20] sm:$0xff] }
  0x3a   :  { %285 = vmatpush.msrb.mxu1 %v141_v7  ;;  %249 = vmatpush.msra.mxu3 %v79_v14  ;;  %v471_v1 = vld [vmem:[#allocation8 + $0x138] sm:$0xff]  ;;  %v452_v2 = vld [vmem:[#allocation8 + $0xa0] sm:$0xff]  ;;  %v470_v4 = vld [vmem:[#allocation8 + $0x130] sm:$0xff] }
  0x3b   :  { %263 = vmatpush.msrb.mxu0 %v134_v9  ;;  %483 = vmatpush.msrb.mxu2 %v444_v40  ;;  %v435_v3 = vld [vmem:[#allocation8 + $0x18] sm:$0xff]  ;;  %v434_v7 = vld [vmem:[#allocation8 + $0x10] sm:$0xff]  ;;  %v469_v8 = vld [vmem:[#allocation8 + $0x128] sm:$0xff] }
  0x3c   :  { %286 = vmatpush.msrb.mxu1 %v135_v10  ;;  %250 = vmatpush.msra.mxu3 %v73_v17  ;;  %v450_v11 = vld [vmem:[#allocation8 + $0x90] sm:$0xff]  ;;  %v468_v14 = vld [vmem:[#allocation8 + $0x120] sm:$0xff]  ;;  %v467_v17 = vld [vmem:[#allocation8 + $0x118] sm:$0xff] }
  0x3d   :  { %264 = vmatpush.msrb.mxu0 %v128_v12  ;;  %251 = vmatmul.f32.vlgmr.msra.gmra.mxu3 %v779_v57 }
  0x3e   :  { %287 = vmatpush.msrb.mxu1 %v129_v13  ;;  %503 = vmatpush.msrb.mxu3 %v463_v35  ;;  %v433_v13 = vld [vmem:[#allocation8 + $0x8] sm:$0xff] }
  0x3f   :  { %265 = vmatpush.msrb.mxu0 %v122_v15  ;;  %484 = vmatpush.msrb.mxu2 %v443_v43  ;;  %v449_v15 = vld [vmem:[#allocation8 + $0x88] sm:$0xff] }
  0x40   :  { %288 = vmatpush.msrb.mxu1 %v123_v16  ;;  %504 = vmatpush.msrb.mxu3 %v462_v37  ;;  %v432_v16 = vld [vmem:[#allocation8] sm:$0xff] }
  0x41   :  { %266 = vmatpush.msrb.mxu0 %v116_v18  ;;  %485 = vmatpush.msrb.mxu2 %v442_v46  ;;  %v448_v18 = vld [vmem:[#allocation8 + $0x80] sm:$0xff] }
  0x42   :  { %289 = vmatpush.msrb.mxu1 %v117_v19  ;;  %505 = vmatpush.msrb.mxu3 %v461_v39  ;;  %v466_v19 = vld [vmem:[#allocation8 + $0x110] sm:$0xff] }
  0x43   :  { %267 = vmatpush.msrb.mxu0 %v110_v20  ;;  %486 = vmatpush.msrb.mxu2 %v441_v49 }
  0x44   :  { %290 = vmatpush.msrb.mxu1 %v111_v21  ;;  %506 = vmatpush.msrb.mxu3 %v460_v42 }
  0x45   :  { %268 = vmatpush.msrb.mxu0 %v104_v22  ;;  %254 = vmatmul.f32.gmra.mxu3 %v784_v5  ;;  %v465_v22 = vld [vmem:[#allocation8 + $0x108] sm:$0xff] }
  0x46   :  { %291 = vmatpush.msrb.mxu1 %v105_v23  ;;  %507 = vmatpush.msrb.mxu3 %v459_v45 }
  0x47   :  { %269 = vmatpush.msrb.mxu0 %v98_v24  ;;  %487 = vmatpush.msrb.mxu2 %v440_v52 }
  0x48   :  { %292 = vmatpush.msrb.mxu1 %v99_v25  ;;  %508 = vmatpush.msrb.mxu3 %v458_v48 }
  0x49   :  { %270 = vmatpush.msrb.mxu0 %v92_v26  ;;  %488 = vmatpush.msrb.mxu2 %v439_v55 }
  0x4a   :  { %293 = vmatpush.msrb.mxu1 %v93_v27  ;;  %509 = vmatpush.msrb.mxu3 %v457_v51 }
  0x4b   :  { %271 = vmatpush.msrb.mxu0 %v86_v28  ;;  %489 = vmatpush.msrb.mxu2 %v438_v58 }
  0x4c   :  { %294 = vmatpush.msrb.mxu1 %v87_v29  ;;  %510 = vmatpush.msrb.mxu3 %v456_v54  ;;  %v464_v29 = vld [vmem:[#allocation8 + $0x100] sm:$0xff] }
  0x4d   :  { %272 = vmatpush.msrb.mxu0 %v80_v30  ;;  %490 = vmatpush.msrb.mxu2 %v437_v61 }
  0x4e   :  { %295 = vmatpush.msrb.mxu1 %v81_v31 }
  0x4f   :  { %273 = vmatpush.msrb.mxu0 %v74_v32  ;;  %491 = vmatpush.msrb.mxu2 %v436_v0 }
  0x50   :  { %274 = vmatmul.f32.vlgmr.msrb.gmra.mxu0 %v779_v57  ;;  %296 = vmatpush.msrb.mxu1 %v75_v33 }
  0x51   :  { %297 = vmatmul.f32.vlgmr.msrb.gmra.mxu1 %v779_v57  ;;  %526 = vmatpush.msra.mxu0 %v479_v41  ;;  %v455_v57 = vld [vmem:[#allocation8 + $0xb8] sm:$0xff] }
  0x52   :  { %586 = vmatpush.msra.mxu1 %v479_v41  ;;  %511 = vmatpush.msrb.mxu3 %v455_v57 }
  0x53   :  { %527 = vmatpush.msra.mxu0 %v478_v44  ;;  %492 = vmatpush.msrb.mxu2 %v435_v3 }
  0x54   :  { %587 = vmatpush.msra.mxu1 %v478_v44  ;;  %512 = vmatpush.msrb.mxu3 %v454_v60 }
  0x55   :  { %528 = vmatpush.msra.mxu0 %v477_v47  ;;  %493 = vmatpush.msrb.mxu2 %v434_v7 }
  0x56   :  { %588 = vmatpush.msra.mxu1 %v477_v47  ;;  %513 = vmatpush.msrb.mxu3 %v453_v63 }
  0x57   :  { %529 = vmatpush.msra.mxu0 %v476_v50  ;;  %494 = vmatpush.msrb.mxu2 %v433_v13 }
  0x58   :  { %277 = vmatmul.f32.gmra.mxu0 %v784_v5  ;;  %589 = vmatpush.msra.mxu1 %v476_v50 }
  0x59   :  { %300 = vmatmul.f32.gmra.mxu1 %v784_v5  ;;  %530 = vmatpush.msra.mxu0 %v475_v53  ;;  %v451_v5 = vld [vmem:[#allocation8 + $0x98] sm:$0xff] }
  0x5a   :  { %590 = vmatpush.msra.mxu1 %v475_v53  ;;  %514 = vmatpush.msrb.mxu3 %v452_v2 }
  0x5b   :  { %531 = vmatpush.msra.mxu0 %v474_v56  ;;  %495 = vmatpush.msrb.mxu2 %v432_v16 }
  0x5c   :  { %591 = vmatpush.msra.mxu1 %v474_v56  ;;  %515 = vmatpush.msrb.mxu3 %v451_v5 }
  0x5d   :  { %532 = vmatpush.msra.mxu0 %v473_v59 }
  0x5e   :  { %592 = vmatpush.msra.mxu1 %v473_v59  ;;  %516 = vmatpush.msrb.mxu3 %v450_v11 }
  0x5f   :  { %533 = vmatpush.msra.mxu0 %v472_v62 }
  0x60   :  { %593 = vmatpush.msra.mxu1 %v472_v62  ;;  %517 = vmatpush.msrb.mxu3 %v449_v15 }
  0x61   :  { %534 = vmatpush.msra.mxu0 %v471_v1 }
  0x62   :  { %594 = vmatpush.msra.mxu1 %v471_v1  ;;  %518 = vmatpush.msrb.mxu3 %v448_v18 }
  0x63   :  { %535 = vmatpush.msra.mxu0 %v470_v4 }
  0x64   :  { %595 = vmatpush.msra.mxu1 %v470_v4 }
  0x65   :  { %536 = vmatpush.msra.mxu0 %v469_v8 }
  0x66   :  { %596 = vmatpush.msra.mxu1 %v469_v8 }
  0x67   :  { %537 = vmatpush.msra.mxu0 %v468_v14 }
  0x68   :  { %597 = vmatpush.msra.mxu1 %v468_v14 }
  0x69   :  { %538 = vmatpush.msra.mxu0 %v467_v17 }
  0x6a   :  { %598 = vmatpush.msra.mxu1 %v467_v17 }
  0x6b   :  { %539 = vmatpush.msra.mxu0 %v466_v19 }
  0x6c   :  { %599 = vmatpush.msra.mxu1 %v466_v19 }
  0x6d   :  { %540 = vmatpush.msra.mxu0 %v465_v22 }
  0x6e   :  { %600 = vmatpush.msra.mxu1 %v465_v22 }
  0x6f   :  { %541 = vmatpush.msra.mxu0 %v464_v29 }
  0x70   :  { %601 = vmatpush.msra.mxu1 %v464_v29 }
  0xac   :  { %v795_v6 = vpop.f32.mrf.mxu0 }
  0xad   :  { %v580_v9 = vmul.f32 -1.442695, %v795_v6  ;;  %v798_v10 = vpop.f32.mrf.mxu1 }
  0xae   :  { %v581_v12 = vmul.f32 -1.442695, %v798_v10 }
  0xaf   :  { %610 = vpow2.f32 %v580_v9 }
  0xb0   :  { %612 = vpow2.f32 %v581_v12 }
  0xb3   :  { %v801_v20 = vpop.f32.mrf.mxu2 }
  0xb4   :  { %v582_v21 = vmul.f32 -1.442695, %v801_v20 }
  0xb5   :  { %v611_v23 = vpop.eup %610  ;;  %v804_v24 = vpop.f32.mrf.mxu0 }
  0xb6   :  { %v806_v25 = vpop.f32.mrf.mxu1  ;;  %v613_v26 = vpop.eup %612  ;;  %v322_v27 = vadd.f32 1.0, %v611_v23  ;;  %614 = vpow2.f32 %v582_v21  ;;  %v583_v28 = vmul.f32 -1.442695, %v804_v24 }
  0xb7   :  { %v323_v30 = vadd.f32 1.0, %v613_v26  ;;  %v584_v31 = vmul.f32 -1.442695, %v806_v25 }
  0xb8   :  { %616 = vrcp.f32 %v322_v27  ;;  %v337_v43 = vand.u32 2147483647, %v322_v27  ;;  %v339_v45 = vand.u32 2147483648, %v322_v27  ;;  %vm333_vm2 = vweird.f32 %v322_v27 }
  0xb9   :  { %618 = vrcp.f32 %v323_v30  ;;  %v352_v47 = vand.u32 2147483647, %v323_v30  ;;  %v354_v50 = vand.u32 2147483648, %v323_v30  ;;  %vm348_vm4 = vweird.f32 %v323_v30 }
  0xba   :  { %620 = vpow2.f32 %v583_v28  ;;  %vm338_vm3 = vcmp.eq.f32.partialorder %v337_v43, 8.507059e+37  ;;  %v340_v54 = vor.u32 1.1754944e-38, %v339_v45 }
  0xbb   :  { %622 = vpow2.f32 %v584_v31  ;;  %vm353_vm6 = vcmp.eq.f32.partialorder %v352_v47, 8.507059e+37  ;;  %v355_v59 = vor.u32 1.1754944e-38, %v354_v50 }
  0xbc   :  { %v615_v32 = vpop.eup %614  ;;  %v810_v33 = vpop.f32.mrf.mxu2 }
  0xbd   :  { %v324_v34 = vadd.f32 1.0, %v615_v32  ;;  %v585_v35 = vmul.f32 -1.442695, %v810_v33 }
  0xbe   :  { %v617_v36 = vpop.eup %616 }
  0xbf   :  { %v619_v37 = vpop.eup %618  ;;  %v329_v38 = vmul.f32 %v617_v36, %v322_v27  ;;  %624 = vrcp.f32 %v324_v34  ;;  %vm334_vm0 = vweird.f32 %v617_v36  ;;  %v367_v60 = vand.u32 2147483647, %v324_v34 }
  0xc0   :  { %v621_v39 = vpop.eup %620  ;;  %v344_v40 = vmul.f32 %v619_v37, %v323_v30  ;;  %626 = vpow2.f32 %v585_v35  ;;  %vm349_vm1 = vweird.f32 %v619_v37  ;;  %vm335_vm5 = vmor %vm333_vm2, %vm334_vm0  ;;  %v369_v61 = vand.u32 2147483648, %v324_v34  ;;  %v252_v5 = vpop.f32.mrf.mxu3 }
  0xc1   :  { %v623_v41 = vpop.eup %622  ;;  %v330_v42 = vsub.f32 1.0, %v329_v38  ;;  %v813_v44 = vadd.f32 1.0, %v621_v39  ;;  %vm350_vm7 = vmor %vm348_vm4, %vm349_vm1  ;;  %vm363_vm8 = vweird.f32 %v324_v34  ;;  %vm824_vm10 = vcmp.eq.f32.partialorder %v367_v60, 8.507059e+37 }
  0xc2   :  { %v345_v46 = vsub.f32 1.0, %v344_v40  ;;  %v815_v48 = vadd.f32 1.0, %v623_v41 }
  0xc3   :  { %v331_v49 = vmul.f32 %v617_v36, %v330_v42  ;;  %628 = vrcp.f32 %v813_v44  ;;  %v382_v16 = vand.u32 2147483647, %v813_v44  ;;  %v384_v17 = vand.u32 2147483648, %v813_v44 }
  0xc4   :  { %v346_v51 = vmul.f32 %v619_v37, %v345_v46  ;;  %630 = vrcp.f32 %v815_v48  ;;  %v397_v19 = vand.u32 2147483647, %v815_v48  ;;  %v399_v26 = vand.u32 2147483648, %v815_v48 }
  0xc5   :  { %v625_v52 = vpop.eup %624  ;;  %v332_v53 = vadd.f32 %v617_v36, %v331_v49  ;;  %vm378_vm14 = vweird.f32 %v813_v44  ;;  %vm383_vm0 = vcmp.eq.f32.partialorder %v382_v16, 8.507059e+37  ;;  %v385_v35 = vor.u32 1.1754944e-38, %v384_v17 }
  0xc6   :  { %v347_v55 = vadd.f32 %v619_v37, %v346_v51  ;;  %v359_v56 = vmul.f32 %v625_v52, %v324_v34  ;;  %v627_v57 = vpop.eup %626  ;;  %vm364_vm9 = vweird.f32 %v625_v52  ;;  %vm393_vm1 = vweird.f32 %v815_v48 }
  0xc7   :  { %v336_v58 = vsel %vm335_vm5, %v617_v36, %v332_v53  ;;  %v819_v1 = vadd.f32 1.0, %v627_v57  ;;  %vm365_vm11 = vmor %vm363_vm8, %vm364_vm9  ;;  %v400_v38 = vor.u32 1.1754944e-38, %v399_v26 }
  0xc8   :  { %v341_v62 = vsel %vm338_vm3, %v340_v54, %v336_v58  ;;  %v351_v63 = vsel %vm350_vm7, %v619_v37, %v347_v55  ;;  %v360_v0 = vsub.f32 1.0, %v359_v56  ;;  %vm398_vm3 = vcmp.eq.f32.partialorder %v397_v19, 8.507059e+37  ;;  %v255_v42 = vpop.f32.mrf.mxu3 }
  0xc9   :  { %v629_v2 = vpop.eup %628  ;;  %v418_v3 = vmul.f32 %v341_v62, %v795_v6  ;;  %v356_v4 = vsel %vm353_vm6, %v355_v59, %v351_v63  ;;  %632 = vrcp.f32 %v819_v1  ;;  %v370_v6 = vor.u32 1.1754944e-38, %v369_v61 }
  0xca   :  { %v631_v7 = vpop.eup %630  ;;  %v361_v8 = vmul.f32 %v625_v52, %v360_v0  ;;  %v374_v9 = vmul.f32 %v629_v2, %v813_v44  ;;  %v419_v11 = vmul.f32 %v356_v4, %v798_v10  ;;  %vm379_vm12 = vweird.f32 %v629_v2 }
  0xcb   :  { %v389_v13 = vmul.f32 %v631_v7, %v815_v48  ;;  %v424_v10 = vmul.f32 %v418_v3, %v252_v5  ;;  %vm394_vm13 = vweird.f32 %v631_v7  ;;  %vm380_vm15 = vmor %vm378_vm14, %vm379_vm12  ;;  %v414_v47 = vand.u32 2147483648, %v819_v1 }
  0xcc   :  { %v362_v14 = vadd.f32 %v625_v52, %v361_v8  ;;  %v375_v15 = vsub.f32 1.0, %v374_v9  ;;  %vm395_vm2 = vmor %vm393_vm1, %vm394_vm13  ;;  %v412_v50 = vand.u32 2147483647, %v819_v1  ;;  %vm408_vm5 = vweird.f32 %v819_v1 }
  0xcd   :  { %v390_v18 = vsub.f32 1.0, %v389_v13  ;;  %v275_v21 = vpop.f32.mrf.mxu0  ;;  %496 = vmatmul.f32.vlgmr.msrb.gmra.mxu2 %v424_v10 }
  0xce   :  { %v366_v22 = vsel %vm365_vm11, %v625_v52, %v362_v14  ;;  %v376_v23 = vmul.f32 %v629_v2, %v375_v15  ;;  %v425_v29 = vmul.f32 %v419_v11, %v275_v21  ;;  %v298_v30 = vpop.f32.mrf.mxu1  ;;  %vm413_vm7 = vcmp.eq.f32.partialorder %v412_v50, 8.507059e+37 }
  0xcf   :  { %v371_v27 = vsel %vm824_vm10, %v370_v6, %v366_v22  ;;  %v391_v28 = vmul.f32 %v631_v7, %v390_v18  ;;  %v633_v34 = vpop.eup %632 }
  0xd0   :  { %v420_v31 = vmul.f32 %v371_v27, %v801_v20  ;;  %v377_v32 = vadd.f32 %v629_v2, %v376_v23  ;;  %519 = vmatmul.f32.vlgmr.msrb.gmra.mxu3 %v425_v29  ;;  %v404_v39 = vmul.f32 %v633_v34, %v819_v1  ;;  %vm409_vm4 = vweird.f32 %v633_v34 }
  0xd1   :  { %v392_v36 = vadd.f32 %v631_v7, %v391_v28  ;;  %vm410_vm6 = vmor %vm408_vm5, %vm409_vm4 }
  0xd2   :  { %v381_v37 = vsel %vm380_vm15, %v629_v2, %v377_v32  ;;  %v426_v40 = vmul.f32 %v420_v31, %v298_v30  ;;  %v405_v45 = vsub.f32 1.0, %v404_v39 }
  0xd3   :  { %v386_v41 = vsel %vm383_vm0, %v385_v35, %v381_v37  ;;  %v396_v20 = vsel %vm395_vm2, %v631_v7, %v392_v36 }
  0xd4   :  { %v421_v43 = vmul.f32 %v386_v41, %v804_v24  ;;  %v401_v44 = vsel %vm398_vm3, %v400_v38, %v396_v20  ;;  %542 = vmatmul.f32.vlgmr.msra.gmra.mxu0 %v426_v40  ;;  %v406_v49 = vmul.f32 %v633_v34, %v405_v45  ;;  %v415_v24 = vor.u32 1.1754944e-38, %v414_v47 }
  0xd5   :  { %v422_v46 = vmul.f32 %v401_v44, %v806_v25  ;;  %v278_v48 = vpop.f32.mrf.mxu0 }
  0xd6   :  { %v427_v51 = vmul.f32 %v421_v43, %v255_v42  ;;  %v407_v53 = vadd.f32 %v633_v34, %v406_v49  ;;  %v301_v25 = vpop.f32.mrf.mxu1 }
  0xd7   :  { %v428_v52 = vmul.f32 %v422_v46, %v278_v48 }
  0xd8   :  { %499 = vmatmul.f32.gmra.mxu2 %v427_v51  ;;  %v411_v54 = vsel %vm410_vm6, %v633_v34, %v407_v53 }
  0xd9   :  { %522 = vmatmul.f32.gmra.mxu3 %v428_v52  ;;  %v416_v55 = vsel %vm413_vm7, %v415_v24, %v411_v54 }
  0xda   :  { %v423_v56 = vmul.f32 %v416_v55, %v810_v33 }
  0xdc   :  { %v429_v57 = vmul.f32 %v423_v56, %v301_v25 }
  0xde   :  { %545 = vmatmul.f32.vlgmr.msra.gmra.mxu1 %v429_v57 }
 0x150   :  { %v497_v58 = vpop.f32.mrf.mxu2 }
 0x151   :  { %v543_v61 = vpop.f32.mrf.mxu0 }
 0x153   :  { %v520_v59 = vpop.f32.mrf.mxu3 }
 0x154   :  { %v521_v60 = vadd.f32 %v520_v59, %v497_v58 }
 0x156   :  { %v544_v62 = vadd.f32 %v543_v61, %v521_v60 }
 0x158   :  { %558 = vst [vmem:[#allocation9] sm:$0xff] %v544_v62 }
 0x15b   :  { %v500_v63 = vpop.f32.mrf.mxu2  ;;  %v546_v2 = vpop.f32.mrf.mxu1 }
 0x15c   :  { %v523_v0 = vpop.f32.mrf.mxu3 }
 0x15d   :  { %v524_v1 = vadd.f32 %v523_v0, %v500_v63 }
 0x15f   :  { %v547_v3 = vadd.f32 %v546_v2, %v524_v1 }
 0x161   :  { %559 = vst [vmem:[#allocation9 + $0x8] sm:$0xff] %v547_v3 }
 0x162   :  { %572 = dma.vmem_to_hbm [thread:$0]  %s565_s29, 256, %s567_s5, [#allocation5], %s740_s24, %s740_s24, %s741_s25  }
 0x163   :  { %734 = dma.done.wait [#allocation5], 256  }
 0x164   :  { %735 = vsyncadd [#allocation5], 4294967040 }
 0x165   :  { %577 = vsyncpa [#allocation4], 1 }
 0x166   :  { %578 = vsyncpa [#allocation7], 1 }
 0x167   :  { %579 = vsyncpa [#allocation5], 1 }

// kernel: tpu_custom_call.1
= control target key start
LH: loop header
LB: loop body
LE: loop exit
PB: predicated region body
PF: predicated region fallthrough
CT: control target
= control target key end

     0   :  { %8 = vsyncpa [#allocation4], 0  ;;  %s853_s0 = inlined_call_operand.hbm [shape: f32[16,128], index: 0, kind: input, shape index: {}]   ;;  %s854_s1 = inlined_call_operand.hbm [shape: f32[128,768], index: 1, kind: input, shape index: {}]   ;;  %s855_s2 = inlined_call_operand.hbm [shape: f32[384,128], index: 2, kind: input, shape index: {}]   ;;  %s856_s3 = inlined_call_operand.hbm [shape: f32[16,128], index: 3, kind: output, shape index: {}]  }
   0x1   :  { %9 = vsyncpa [#allocation7], 0  ;;  %s28_s14 = sshll.u32 %s854_s1, 4  ;;  %s29_s14 = int_to_ptr.hbm [resolvable:$true] %s28_s14 }
   0x2   :  { %10 = vsyncpa [#allocation5], 0  ;;  %s736_s15 = smov [#allocation6]   ;;  %s15_s19 = sshll.u32 %s853_s0, 4  ;;  %s16_s19 = int_to_ptr.hbm [resolvable:$true] %s15_s19 }
   0x3   :  { %s30_s16 = sshll.u32 %s736_s15, 4  ;;  %s737_s20 = smov 768   ;;  %s31_s16 = int_to_ptr.vmem [resolvable:$true] %s30_s16 }
   0x4   :  { %s738_s21 = smov 48   ;;  %s739_s22 = smov [#allocation3]  }
   0x5   :  { %36 = dma.hbm_to_vmem [thread:$0]  %s29_s14, 12288, %s31_s16, [#allocation7], %s737_s20, %s737_s20, %s738_s21  }
   0x6   :  { %s17_s23 = sshll.u32 %s739_s22, 4  ;;  %s740_s24 = smov 128   ;;  %s18_s23 = int_to_ptr.vmem [resolvable:$true] %s17_s23 }
   0x7   :  { %s741_s25 = smov 8   ;;  %s41_s27 = sshll.u32 %s855_s2, 4  ;;  %s42_s27 = int_to_ptr.hbm [resolvable:$true] %s41_s27 }
   0x8   :  { %23 = dma.hbm_to_vmem [thread:$0]  %s16_s19, 256, %s18_s23, [#allocation4], %s740_s24, %s740_s24, %s741_s25  }
   0x9   :  { %s742_s28 = smov [#allocation8]  }
   0xa   :  { %s43_s0 = sshll.u32 %s742_s28, 4  ;;  %s44_s0 = int_to_ptr.vmem [resolvable:$true] %s43_s0 }
   0xb   :  { %49 = dma.hbm_to_vmem [thread:$0]  %s42_s27, 6144, %s44_s0, [#allocation7], %s740_s24, %s740_s24, %s741_s25  }
   0xc   :  { %730 = dma.done.wait [#allocation4], 256  }
   0xd   :  { %731 = vsyncadd [#allocation4], 4294967040 }
   0xe   :  { %732 = dma.done.wait [#allocation7], 18432  }
   0xf   :  { %733 = vsyncadd [#allocation7], 4294948864  ;;  %v160_v0 = vld [vmem:[#allocation6 + $0x2d0] sm:$0xff]  ;;  %v161_v1 = vld [vmem:[#allocation6 + $0x2d8] sm:$0xff]  ;;  %s743_s2 = smov [#allocation9]   ;;  %s566_s5 = sshll.u32 %s856_s3, 4  ;;  %s567_s5 = int_to_ptr.hbm [resolvable:$true] %s566_s5 }
  0x10   :  { %v162_v2 = vld [vmem:[#allocation6 + $0x2e0] sm:$0xff]  ;;  %166 = vmatpush.msra.mxu0 %v160_v0  ;;  %189 = vmatpush.msra.mxu1 %v161_v1  ;;  %v155_v4 = vld [vmem:[#allocation6 + $0x2a8] sm:$0xff]  ;;  %v156_v5 = vld [vmem:[#allocation6 + $0x2b0] sm:$0xff]  ;;  %s564_s29 = sshll.u32 %s743_s2, 4  ;;  %s565_s29 = int_to_ptr.vmem [resolvable:$true] %s564_s29 }
  0x11   :  { %v154_v3 = vld [vmem:[#allocation6 + $0x2a0] sm:$0xff]  ;;  %212 = vmatpush.msra.mxu2 %v162_v2  ;;  %v148_v6 = vld [vmem:[#allocation6 + $0x270] sm:$0xff]  ;;  %v149_v7 = vld [vmem:[#allocation6 + $0x278] sm:$0xff] }
  0x12   :  { %167 = vmatpush.msra.mxu0 %v154_v3  ;;  %190 = vmatpush.msra.mxu1 %v155_v4  ;;  %v150_v8 = vld [vmem:[#allocation6 + $0x280] sm:$0xff]  ;;  %v143_v10 = vld [vmem:[#allocation6 + $0x248] sm:$0xff]  ;;  %v144_v11 = vld [vmem:[#allocation6 + $0x250] sm:$0xff] }
  0x13   :  { %213 = vmatpush.msra.mxu2 %v156_v5  ;;  %v142_v9 = vld [vmem:[#allocation6 + $0x240] sm:$0xff]  ;;  %v136_v12 = vld [vmem:[#allocation6 + $0x210] sm:$0xff]  ;;  %v137_v13 = vld [vmem:[#allocation6 + $0x218] sm:$0xff] }
  0x14   :  { %168 = vmatpush.msra.mxu0 %v148_v6  ;;  %191 = vmatpush.msra.mxu1 %v149_v7  ;;  %v138_v14 = vld [vmem:[#allocation6 + $0x220] sm:$0xff]  ;;  %v131_v16 = vld [vmem:[#allocation6 + $0x1e8] sm:$0xff]  ;;  %v132_v17 = vld [vmem:[#allocation6 + $0x1f0] sm:$0xff] }
  0x15   :  { %214 = vmatpush.msra.mxu2 %v150_v8  ;;  %v130_v15 = vld [vmem:[#allocation6 + $0x1e0] sm:$0xff]  ;;  %v124_v18 = vld [vmem:[#allocation6 + $0x1b0] sm:$0xff]  ;;  %v125_v19 = vld [vmem:[#allocation6 + $0x1b8] sm:$0xff] }
  0x16   :  { %169 = vmatpush.msra.mxu0 %v142_v9  ;;  %192 = vmatpush.msra.mxu1 %v143_v10  ;;  %v126_v20 = vld [vmem:[#allocation6 + $0x1c0] sm:$0xff]  ;;  %v119_v22 = vld [vmem:[#allocation6 + $0x188] sm:$0xff]  ;;  %v120_v23 = vld [vmem:[#allocation6 + $0x190] sm:$0xff] }
  0x17   :  { %215 = vmatpush.msra.mxu2 %v144_v11  ;;  %v118_v21 = vld [vmem:[#allocation6 + $0x180] sm:$0xff]  ;;  %v163_v24 = vld [vmem:[#allocation6 + $0x2e8] sm:$0xff]  ;;  %v112_v25 = vld [vmem:[#allocation6 + $0x150] sm:$0xff] }
  0x18   :  { %170 = vmatpush.msra.mxu0 %v136_v12  ;;  %193 = vmatpush.msra.mxu1 %v137_v13  ;;  %v113_v26 = vld [vmem:[#allocation6 + $0x158] sm:$0xff]  ;;  %v114_v28 = vld [vmem:[#allocation6 + $0x160] sm:$0xff]  ;;  %v151_v29 = vld [vmem:[#allocation6 + $0x288] sm:$0xff] }
  0x19   :  { %216 = vmatpush.msra.mxu2 %v138_v14  ;;  %235 = vmatpush.msra.mxu3 %v163_v24  ;;  %v157_v27 = vld [vmem:[#allocation6 + $0x2b8] sm:$0xff]  ;;  %v106_v30 = vld [vmem:[#allocation6 + $0x120] sm:$0xff]  ;;  %v107_v31 = vld [vmem:[#allocation6 + $0x128] sm:$0xff] }
  0x1a   :  { %171 = vmatpush.msra.mxu0 %v130_v15  ;;  %194 = vmatpush.msra.mxu1 %v131_v16  ;;  %v108_v32 = vld [vmem:[#allocation6 + $0x130] sm:$0xff]  ;;  %v145_v33 = vld [vmem:[#allocation6 + $0x258] sm:$0xff]  ;;  %v102_v36 = vld [vmem:[#allocation6 + $0x100] sm:$0xff] }
  0x1b   :  { %217 = vmatpush.msra.mxu2 %v132_v17  ;;  %236 = vmatpush.msra.mxu3 %v157_v27  ;;  %v100_v34 = vld [vmem:[#allocation6 + $0xf0] sm:$0xff]  ;;  %v101_v35 = vld [vmem:[#allocation6 + $0xf8] sm:$0xff]  ;;  %v139_v37 = vld [vmem:[#allocation6 + $0x228] sm:$0xff] }
  0x1c   :  { %172 = vmatpush.msra.mxu0 %v124_v18  ;;  %195 = vmatpush.msra.mxu1 %v125_v19  ;;  %v94_v38 = vld [vmem:[#allocation6 + $0xc0] sm:$0xff]  ;;  %v95_v39 = vld [vmem:[#allocation6 + $0xc8] sm:$0xff]  ;;  %v96_v40 = vld [vmem:[#allocation6 + $0xd0] sm:$0xff] }
  0x1d   :  { %218 = vmatpush.msra.mxu2 %v126_v20  ;;  %237 = vmatpush.msra.mxu3 %v151_v29  ;;  %v133_v41 = vld [vmem:[#allocation6 + $0x1f8] sm:$0xff]  ;;  %v88_v42 = vld [vmem:[#allocation6 + $0x90] sm:$0xff]  ;;  %v90_v44 = vld [vmem:[#allocation6 + $0xa0] sm:$0xff] }
  0x1e   :  { %173 = vmatpush.msra.mxu0 %v118_v21  ;;  %196 = vmatpush.msra.mxu1 %v119_v22  ;;  %v89_v43 = vld [vmem:[#allocation6 + $0x98] sm:$0xff]  ;;  %v127_v45 = vld [vmem:[#allocation6 + $0x1c8] sm:$0xff]  ;;  %v82_v46 = vld [vmem:[#allocation6 + $0x60] sm:$0xff] }
  0x1f   :  { %219 = vmatpush.msra.mxu2 %v120_v23  ;;  %238 = vmatpush.msra.mxu3 %v145_v33  ;;  %v83_v47 = vld [vmem:[#allocation6 + $0x68] sm:$0xff]  ;;  %v84_v48 = vld [vmem:[#allocation6 + $0x70] sm:$0xff]  ;;  %v121_v49 = vld [vmem:[#allocation6 + $0x198] sm:$0xff] }
  0x20   :  { %174 = vmatpush.msra.mxu0 %v112_v25  ;;  %197 = vmatpush.msra.mxu1 %v113_v26  ;;  %v76_v50 = vld [vmem:[#allocation6 + $0x30] sm:$0xff]  ;;  %v77_v51 = vld [vmem:[#allocation6 + $0x38] sm:$0xff]  ;;  %v78_v52 = vld [vmem:[#allocation6 + $0x40] sm:$0xff] }
  0x21   :  { %220 = vmatpush.msra.mxu2 %v114_v28  ;;  %239 = vmatpush.msra.mxu3 %v139_v37  ;;  %v115_v53 = vld [vmem:[#allocation6 + $0x168] sm:$0xff]  ;;  %v70_v54 = vld [vmem:[#allocation6] sm:$0xff]  ;;  %v72_v56 = vld [vmem:[#allocation6 + $0x10] sm:$0xff] }
  0x22   :  { %175 = vmatpush.msra.mxu0 %v106_v30  ;;  %198 = vmatpush.msra.mxu1 %v107_v31  ;;  %v71_v55 = vld [vmem:[#allocation6 + $0x8] sm:$0xff]  ;;  %v779_v57 = vld [vmem:[#allocation3] sm:$0xff]  ;;  %v165_v59 = vld [vmem:[#allocation6 + $0x2f8] sm:$0xff] }
  0x23   :  { %221 = vmatpush.msra.mxu2 %v108_v32  ;;  %240 = vmatpush.msra.mxu3 %v133_v41  ;;  %v164_v58 = vld [vmem:[#allocation6 + $0x2f0] sm:$0xff]  ;;  %v109_v60 = vld [vmem:[#allocation6 + $0x138] sm:$0xff]  ;;  %v158_v61 = vld [vmem:[#allocation6 + $0x2c0] sm:$0xff] }
  0x24   :  { %176 = vmatpush.msra.mxu0 %v100_v34  ;;  %199 = vmatpush.msra.mxu1 %v101_v35  ;;  %v159_v62 = vld [vmem:[#allocation6 + $0x2c8] sm:$0xff]  ;;  %v152_v0 = vld [vmem:[#allocation6 + $0x290] sm:$0xff]  ;;  %v153_v1 = vld [vmem:[#allocation6 + $0x298] sm:$0xff] }
  0x25   :  { %222 = vmatpush.msra.mxu2 %v102_v36  ;;  %241 = vmatpush.msra.mxu3 %v127_v45  ;;  %v103_v63 = vld [vmem:[#allocation6 + $0x108] sm:$0xff]  ;;  %v97_v2 = vld [vmem:[#allocation6 + $0xd8] sm:$0xff]  ;;  %v146_v3 = vld [vmem:[#allocation6 + $0x260] sm:$0xff] }
  0x26   :  { %177 = vmatpush.msra.mxu0 %v94_v38  ;;  %200 = vmatpush.msra.mxu1 %v95_v39  ;;  %v147_v4 = vld [vmem:[#allocation6 + $0x268] sm:$0xff]  ;;  %v784_v5 = vld [vmem:[#allocation3 + $0x8] sm:$0xff]  ;;  %v140_v6 = vld [vmem:[#allocation6 + $0x230] sm:$0xff] }
  0x27   :  { %223 = vmatpush.msra.mxu2 %v96_v40  ;;  %242 = vmatpush.msra.mxu3 %v121_v49  ;;  %v141_v7 = vld [vmem:[#allocation6 + $0x238] sm:$0xff]  ;;  %v91_v8 = vld [vmem:[#allocation6 + $0xa8] sm:$0xff]  ;;  %v134_v9 = vld [vmem:[#allocation6 + $0x200] sm:$0xff] }
  0x28   :  { %178 = vmatpush.msra.mxu0 %v88_v42  ;;  %201 = vmatpush.msra.mxu1 %v89_v43  ;;  %v135_v10 = vld [vmem:[#allocation6 + $0x208] sm:$0xff]  ;;  %v85_v11 = vld [vmem:[#allocation6 + $0x78] sm:$0xff]  ;;  %v128_v12 = vld [vmem:[#allocation6 + $0x1d0] sm:$0xff] }
  0x29   :  { %224 = vmatpush.msra.mxu2 %v90_v44  ;;  %243 = vmatpush.msra.mxu3 %v115_v53  ;;  %v129_v13 = vld [vmem:[#allocation6 + $0x1d8] sm:$0xff]  ;;  %v79_v14 = vld [vmem:[#allocation6 + $0x48] sm:$0xff]  ;;  %v122_v15 = vld [vmem:[#allocation6 + $0x1a0] sm:$0xff] }
  0x2a   :  { %179 = vmatpush.msra.mxu0 %v82_v46  ;;  %202 = vmatpush.msra.mxu1 %v83_v47  ;;  %v123_v16 = vld [vmem:[#allocation6 + $0x1a8] sm:$0xff]  ;;  %v73_v17 = vld [vmem:[#allocation6 + $0x18] sm:$0xff]  ;;  %v116_v18 = vld [vmem:[#allocation6 + $0x170] sm:$0xff] }
  0x2b   :  { %225 = vmatpush.msra.mxu2 %v84_v48  ;;  %244 = vmatpush.msra.mxu3 %v109_v60  ;;  %v117_v19 = vld [vmem:[#allocation6 + $0x178] sm:$0xff]  ;;  %v110_v20 = vld [vmem:[#allocation6 + $0x140] sm:$0xff]  ;;  %v111_v21 = vld [vmem:[#allocation6 + $0x148] sm:$0xff] }
  0x2c   :  { %180 = vmatpush.msra.mxu0 %v76_v50  ;;  %203 = vmatpush.msra.mxu1 %v77_v51  ;;  %v104_v22 = vld [vmem:[#allocation6 + $0x110] sm:$0xff]  ;;  %v105_v23 = vld [vmem:[#allocation6 + $0x118] sm:$0xff]  ;;  %v98_v24 = vld [vmem:[#allocation6 + $0xe0] sm:$0xff] }
  0x2d   :  { %226 = vmatpush.msra.mxu2 %v78_v52  ;;  %245 = vmatpush.msra.mxu3 %v103_v63  ;;  %v99_v25 = vld [vmem:[#allocation6 + $0xe8] sm:$0xff]  ;;  %v92_v26 = vld [vmem:[#allocation6 + $0xb0] sm:$0xff]  ;;  %v93_v27 = vld [vmem:[#allocation6 + $0xb8] sm:$0xff] }
  0x2e   :  { %181 = vmatpush.msra.mxu0 %v70_v54  ;;  %204 = vmatpush.msra.mxu1 %v71_v55  ;;  %v86_v28 = vld [vmem:[#allocation6 + $0x80] sm:$0xff]  ;;  %v87_v29 = vld [vmem:[#allocation6 + $0x88] sm:$0xff]  ;;  %v80_v30 = vld [vmem:[#allocation6 + $0x50] sm:$0xff] }
  0x2f   :  { %227 = vmatpush.msra.mxu2 %v72_v56  ;;  %182 = vmatmul.f32.vlgmr.msra.gmra.mxu0 %v779_v57  ;;  %v81_v31 = vld [vmem:[#allocation6 + $0x58] sm:$0xff]  ;;  %v74_v32 = vld [vmem:[#allocation6 + $0x20] sm:$0xff]  ;;  %v75_v33 = vld [vmem:[#allocation6 + $0x28] sm:$0xff] }
  0x30   :  { %205 = vmatmul.f32.vlgmr.msra.gmra.mxu1 %v779_v57  ;;  %228 = vmatmul.f32.vlgmr.msra.gmra.mxu2 %v779_v57  ;;  %v447_v34 = vld [vmem:[#allocation8 + $0x78] sm:$0xff]  ;;  %v446_v36 = vld [vmem:[#allocation8 + $0x70] sm:$0xff]  ;;  %v445_v38 = vld [vmem:[#allocation8 + $0x68] sm:$0xff] }
  0x31   :  { %258 = vmatpush.msrb.mxu0 %v164_v58  ;;  %281 = vmatpush.msrb.mxu1 %v165_v59  ;;  %v463_v35 = vld [vmem:[#allocation8 + $0xf8] sm:$0xff]  ;;  %v462_v37 = vld [vmem:[#allocation8 + $0xf0] sm:$0xff]  ;;  %v461_v39 = vld [vmem:[#allocation8 + $0xe8] sm:$0xff] }
  0x32   :  { %246 = vmatpush.msra.mxu3 %v97_v2  ;;  %480 = vmatpush.msrb.mxu2 %v447_v34  ;;  %v444_v40 = vld [vmem:[#allocation8 + $0x60] sm:$0xff]  ;;  %v479_v41 = vld [vmem:[#allocation8 + $0x178] sm:$0xff]  ;;  %v478_v44 = vld [vmem:[#allocation8 + $0x170] sm:$0xff] }
  0x33   :  { %259 = vmatpush.msrb.mxu0 %v158_v61  ;;  %282 = vmatpush.msrb.mxu1 %v159_v62  ;;  %v460_v42 = vld [vmem:[#allocation8 + $0xe0] sm:$0xff]  ;;  %v443_v43 = vld [vmem:[#allocation8 + $0x58] sm:$0xff]  ;;  %v442_v46 = vld [vmem:[#allocation8 + $0x50] sm:$0xff] }
  0x34   :  { %247 = vmatpush.msra.mxu3 %v91_v8  ;;  %481 = vmatpush.msrb.mxu2 %v446_v36  ;;  %v459_v45 = vld [vmem:[#allocation8 + $0xd8] sm:$0xff]  ;;  %v477_v47 = vld [vmem:[#allocation8 + $0x168] sm:$0xff]  ;;  %v458_v48 = vld [vmem:[#allocation8 + $0xd0] sm:$0xff] }
  0x35   :  { %260 = vmatpush.msrb.mxu0 %v152_v0  ;;  %283 = vmatpush.msrb.mxu1 %v153_v1  ;;  %v441_v49 = vld [vmem:[#allocation8 + $0x48] sm:$0xff]  ;;  %v476_v50 = vld [vmem:[#allocation8 + $0x160] sm:$0xff]  ;;  %v475_v53 = vld [vmem:[#allocation8 + $0x158] sm:$0xff] }
  0x36   :  { %248 = vmatpush.msra.mxu3 %v85_v11  ;;  %482 = vmatpush.msrb.mxu2 %v445_v38  ;;  %v457_v51 = vld [vmem:[#allocation8 + $0xc8] sm:$0xff]  ;;  %v440_v52 = vld [vmem:[#allocation8 + $0x40] sm:$0xff]  ;;  %v439_v55 = vld [vmem:[#allocation8 + $0x38] sm:$0xff] }
  0x37   :  { %261 = vmatpush.msrb.mxu0 %v146_v3  ;;  %284 = vmatpush.msrb.mxu1 %v147_v4  ;;  %v456_v54 = vld [vmem:[#allocation8 + $0xc0] sm:$0xff]  ;;  %v474_v56 = vld [vmem:[#allocation8 + $0x150] sm:$0xff]  ;;  %v473_v59 = vld [vmem:[#allocation8 + $0x148] sm:$0xff] }
  0x38   :  { %185 = vmatmul.f32.gmra.mxu0 %v784_v5  ;;  %208 = vmatmul.f32.gmra.mxu1 %v784_v5  ;;  %v438_v58 = vld [vmem:[#allocation8 + $0x30] sm:$0xff]  ;;  %v437_v61 = vld [vmem:[#allocation8 + $0x28] sm:$0xff]  ;;  %v472_v62 = vld [vmem:[#allocation8 + $0x140] sm:$0xff] }
  0x39   :  { %231 = vmatmul.f32.gmra.mxu2 %v784_v5  ;;  %262 = vmatpush.msrb.mxu0 %v140_v6  ;;  %v454_v60 = vld [vmem:[#allocation8 + $0xb0] sm:$0xff]  ;;  %v453_v63 = vld [vmem:[#allocation8 + $0xa8] sm:$0xff]  ;;  %v436_v0 = vld [vmem:[#allocation8 + $0x20] sm:$0xff] }
  0x3a   :  { %285 = vmatpush.msrb.mxu1 %v141_v7  ;;  %249 = vmatpush.msra.mxu3 %v79_v14  ;;  %v471_v1 = vld [vmem:[#allocation8 + $0x138] sm:$0xff]  ;;  %v452_v2 = vld [vmem:[#allocation8 + $0xa0] sm:$0xff]  ;;  %v470_v4 = vld [vmem:[#allocation8 + $0x130] sm:$0xff] }
  0x3b   :  { %263 = vmatpush.msrb.mxu0 %v134_v9  ;;  %483 = vmatpush.msrb.mxu2 %v444_v40  ;;  %v435_v3 = vld [vmem:[#allocation8 + $0x18] sm:$0xff]  ;;  %v434_v7 = vld [vmem:[#allocation8 + $0x10] sm:$0xff]  ;;  %v469_v8 = vld [vmem:[#allocation8 + $0x128] sm:$0xff] }
  0x3c   :  { %286 = vmatpush.msrb.mxu1 %v135_v10  ;;  %250 = vmatpush.msra.mxu3 %v73_v17  ;;  %v450_v11 = vld [vmem:[#allocation8 + $0x90] sm:$0xff]  ;;  %v468_v14 = vld [vmem:[#allocation8 + $0x120] sm:$0xff]  ;;  %v467_v17 = vld [vmem:[#allocation8 + $0x118] sm:$0xff] }
  0x3d   :  { %264 = vmatpush.msrb.mxu0 %v128_v12  ;;  %251 = vmatmul.f32.vlgmr.msra.gmra.mxu3 %v779_v57 }
  0x3e   :  { %287 = vmatpush.msrb.mxu1 %v129_v13  ;;  %503 = vmatpush.msrb.mxu3 %v463_v35  ;;  %v433_v13 = vld [vmem:[#allocation8 + $0x8] sm:$0xff] }
  0x3f   :  { %265 = vmatpush.msrb.mxu0 %v122_v15  ;;  %484 = vmatpush.msrb.mxu2 %v443_v43  ;;  %v449_v15 = vld [vmem:[#allocation8 + $0x88] sm:$0xff] }
  0x40   :  { %288 = vmatpush.msrb.mxu1 %v123_v16  ;;  %504 = vmatpush.msrb.mxu3 %v462_v37  ;;  %v432_v16 = vld [vmem:[#allocation8] sm:$0xff] }
  0x41   :  { %266 = vmatpush.msrb.mxu0 %v116_v18  ;;  %485 = vmatpush.msrb.mxu2 %v442_v46  ;;  %v448_v18 = vld [vmem:[#allocation8 + $0x80] sm:$0xff] }
  0x42   :  { %289 = vmatpush.msrb.mxu1 %v117_v19  ;;  %505 = vmatpush.msrb.mxu3 %v461_v39  ;;  %v466_v19 = vld [vmem:[#allocation8 + $0x110] sm:$0xff] }
  0x43   :  { %267 = vmatpush.msrb.mxu0 %v110_v20  ;;  %486 = vmatpush.msrb.mxu2 %v441_v49 }
  0x44   :  { %290 = vmatpush.msrb.mxu1 %v111_v21  ;;  %506 = vmatpush.msrb.mxu3 %v460_v42 }
  0x45   :  { %268 = vmatpush.msrb.mxu0 %v104_v22  ;;  %254 = vmatmul.f32.gmra.mxu3 %v784_v5  ;;  %v465_v22 = vld [vmem:[#allocation8 + $0x108] sm:$0xff] }
  0x46   :  { %291 = vmatpush.msrb.mxu1 %v105_v23  ;;  %507 = vmatpush.msrb.mxu3 %v459_v45 }
  0x47   :  { %269 = vmatpush.msrb.mxu0 %v98_v24  ;;  %487 = vmatpush.msrb.mxu2 %v440_v52 }
  0x48   :  { %292 = vmatpush.msrb.mxu1 %v99_v25  ;;  %508 = vmatpush.msrb.mxu3 %v458_v48 }
  0x49   :  { %270 = vmatpush.msrb.mxu0 %v92_v26  ;;  %488 = vmatpush.msrb.mxu2 %v439_v55 }
  0x4a   :  { %293 = vmatpush.msrb.mxu1 %v93_v27  ;;  %509 = vmatpush.msrb.mxu3 %v457_v51 }
  0x4b   :  { %271 = vmatpush.msrb.mxu0 %v86_v28  ;;  %489 = vmatpush.msrb.mxu2 %v438_v58 }
  0x4c   :  { %294 = vmatpush.msrb.mxu1 %v87_v29  ;;  %510 = vmatpush.msrb.mxu3 %v456_v54  ;;  %v464_v29 = vld [vmem:[#allocation8 + $0x100] sm:$0xff] }
  0x4d   :  { %272 = vmatpush.msrb.mxu0 %v80_v30  ;;  %490 = vmatpush.msrb.mxu2 %v437_v61 }
  0x4e   :  { %295 = vmatpush.msrb.mxu1 %v81_v31 }
  0x4f   :  { %273 = vmatpush.msrb.mxu0 %v74_v32  ;;  %491 = vmatpush.msrb.mxu2 %v436_v0 }
  0x50   :  { %274 = vmatmul.f32.vlgmr.msrb.gmra.mxu0 %v779_v57  ;;  %296 = vmatpush.msrb.mxu1 %v75_v33 }
  0x51   :  { %297 = vmatmul.f32.vlgmr.msrb.gmra.mxu1 %v779_v57  ;;  %526 = vmatpush.msra.mxu0 %v479_v41  ;;  %v455_v57 = vld [vmem:[#allocation8 + $0xb8] sm:$0xff] }
  0x52   :  { %586 = vmatpush.msra.mxu1 %v479_v41  ;;  %511 = vmatpush.msrb.mxu3 %v455_v57 }
  0x53   :  { %527 = vmatpush.msra.mxu0 %v478_v44  ;;  %492 = vmatpush.msrb.mxu2 %v435_v3 }
  0x54   :  { %587 = vmatpush.msra.mxu1 %v478_v44  ;;  %512 = vmatpush.msrb.mxu3 %v454_v60 }
  0x55   :  { %528 = vmatpush.msra.mxu0 %v477_v47  ;;  %493 = vmatpush.msrb.mxu2 %v434_v7 }
  0x56   :  { %588 = vmatpush.msra.mxu1 %v477_v47  ;;  %513 = vmatpush.msrb.mxu3 %v453_v63 }
  0x57   :  { %529 = vmatpush.msra.mxu0 %v476_v50  ;;  %494 = vmatpush.msrb.mxu2 %v433_v13 }
  0x58   :  { %277 = vmatmul.f32.gmra.mxu0 %v784_v5  ;;  %589 = vmatpush.msra.mxu1 %v476_v50 }
  0x59   :  { %300 = vmatmul.f32.gmra.mxu1 %v784_v5  ;;  %530 = vmatpush.msra.mxu0 %v475_v53  ;;  %v451_v5 = vld [vmem:[#allocation8 + $0x98] sm:$0xff] }
  0x5a   :  { %590 = vmatpush.msra.mxu1 %v475_v53  ;;  %514 = vmatpush.msrb.mxu3 %v452_v2 }
  0x5b   :  { %531 = vmatpush.msra.mxu0 %v474_v56  ;;  %495 = vmatpush.msrb.mxu2 %v432_v16 }
  0x5c   :  { %591 = vmatpush.msra.mxu1 %v474_v56  ;;  %515 = vmatpush.msrb.mxu3 %v451_v5 }
  0x5d   :  { %532 = vmatpush.msra.mxu0 %v473_v59 }
  0x5e   :  { %592 = vmatpush.msra.mxu1 %v473_v59  ;;  %516 = vmatpush.msrb.mxu3 %v450_v11 }
  0x5f   :  { %533 = vmatpush.msra.mxu0 %v472_v62 }
  0x60   :  { %593 = vmatpush.msra.mxu1 %v472_v62  ;;  %517 = vmatpush.msrb.mxu3 %v449_v15 }
  0x61   :  { %534 = vmatpush.msra.mxu0 %v471_v1 }
  0x62   :  { %594 = vmatpush.msra.mxu1 %v471_v1  ;;  %518 = vmatpush.msrb.mxu3 %v448_v18 }
  0x63   :  { %535 = vmatpush.msra.mxu0 %v470_v4 }
  0x64   :  { %595 = vmatpush.msra.mxu1 %v470_v4 }
  0x65   :  { %536 = vmatpush.msra.mxu0 %v469_v8 }
  0x66   :  { %596 = vmatpush.msra.mxu1 %v469_v8 }
  0x67   :  { %537 = vmatpush.msra.mxu0 %v468_v14 }
  0x68   :  { %597 = vmatpush.msra.mxu1 %v468_v14 }
  0x69   :  { %538 = vmatpush.msra.mxu0 %v467_v17 }
  0x6a   :  { %598 = vmatpush.msra.mxu1 %v467_v17 }
  0x6b   :  { %539 = vmatpush.msra.mxu0 %v466_v19 }
  0x6c   :  { %599 = vmatpush.msra.mxu1 %v466_v19 }
  0x6d   :  { %540 = vmatpush.msra.mxu0 %v465_v22 }
  0x6e   :  { %600 = vmatpush.msra.mxu1 %v465_v22 }
  0x6f   :  { %541 = vmatpush.msra.mxu0 %v464_v29 }
  0x70   :  { %601 = vmatpush.msra.mxu1 %v464_v29 }
  0xac   :  { %v795_v6 = vpop.f32.mrf.mxu0 }
  0xad   :  { %v580_v9 = vmul.f32 -1.442695, %v795_v6  ;;  %v798_v10 = vpop.f32.mrf.mxu1 }
  0xae   :  { %v581_v12 = vmul.f32 -1.442695, %v798_v10 }
  0xaf   :  { %610 = vpow2.f32 %v580_v9 }
  0xb0   :  { %612 = vpow2.f32 %v581_v12 }
  0xb3   :  { %v801_v20 = vpop.f32.mrf.mxu2 }
  0xb4   :  { %v582_v21 = vmul.f32 -1.442695, %v801_v20 }
  0xb5   :  { %v611_v23 = vpop.eup %610  ;;  %v804_v24 = vpop.f32.mrf.mxu0 }
  0xb6   :  { %v806_v25 = vpop.f32.mrf.mxu1  ;;  %v613_v26 = vpop.eup %612  ;;  %v322_v27 = vadd.f32 1.0, %v611_v23  ;;  %614 = vpow2.f32 %v582_v21  ;;  %v583_v28 = vmul.f32 -1.442695, %v804_v24 }
  0xb7   :  { %v323_v30 = vadd.f32 1.0, %v613_v26  ;;  %v584_v31 = vmul.f32 -1.442695, %v806_v25 }
  0xb8   :  { %616 = vrcp.f32 %v322_v27  ;;  %v337_v43 = vand.u32 2147483647, %v322_v27  ;;  %v339_v45 = vand.u32 2147483648, %v322_v27  ;;  %vm333_vm2 = vweird.f32 %v322_v27 }
  0xb9   :  { %618 = vrcp.f32 %v323_v30  ;;  %v352_v47 = vand.u32 2147483647, %v323_v30  ;;  %v354_v50 = vand.u32 2147483648, %v323_v30  ;;  %vm348_vm4 = vweird.f32 %v323_v30 }
  0xba   :  { %620 = vpow2.f32 %v583_v28  ;;  %vm338_vm3 = vcmp.eq.f32.partialorder %v337_v43, 8.507059e+37  ;;  %v340_v54 = vor.u32 1.1754944e-38, %v339_v45 }
  0xbb   :  { %622 = vpow2.f32 %v584_v31  ;;  %vm353_vm6 = vcmp.eq.f32.partialorder %v352_v47, 8.507059e+37  ;;  %v355_v59 = vor.u32 1.1754944e-38, %v354_v50 }
  0xbc   :  { %v615_v32 = vpop.eup %614  ;;  %v810_v33 = vpop.f32.mrf.mxu2 }
  0xbd   :  { %v324_v34 = vadd.f32 1.0, %v615_v32  ;;  %v585_v35 = vmul.f32 -1.442695, %v810_v33 }
  0xbe   :  { %v617_v36 = vpop.eup %616 }
  0xbf   :  { %v619_v37 = vpop.eup %618  ;;  %v329_v38 = vmul.f32 %v617_v36, %v322_v27  ;;  %624 = vrcp.f32 %v324_v34  ;;  %vm334_vm0 = vweird.f32 %v617_v36  ;;  %v367_v60 = vand.u32 2147483647, %v324_v34 }
  0xc0   :  { %v621_v39 = vpop.eup %620  ;;  %v344_v40 = vmul.f32 %v619_v37, %v323_v30  ;;  %626 = vpow2.f32 %v585_v35  ;;  %vm349_vm1 = vweird.f32 %v619_v37  ;;  %vm335_vm5 = vmor %vm333_vm2, %vm334_vm0  ;;  %v369_v61 = vand.u32 2147483648, %v324_v34  ;;  %v252_v5 = vpop.f32.mrf.mxu3 }
  0xc1   :  { %v623_v41 = vpop.eup %622  ;;  %v330_v42 = vsub.f32 1.0, %v329_v38  ;;  %v813_v44 = vadd.f32 1.0, %v621_v39  ;;  %vm350_vm7 = vmor %vm348_vm4, %vm349_vm1  ;;  %vm363_vm8 = vweird.f32 %v324_v34  ;;  %vm824_vm10 = vcmp.eq.f32.partialorder %v367_v60, 8.507059e+37 }
  0xc2   :  { %v345_v46 = vsub.f32 1.0, %v344_v40  ;;  %v815_v48 = vadd.f32 1.0, %v623_v41 }
  0xc3   :  { %v331_v49 = vmul.f32 %v617_v36, %v330_v42  ;;  %628 = vrcp.f32 %v813_v44  ;;  %v382_v16 = vand.u32 2147483647, %v813_v44  ;;  %v384_v17 = vand.u32 2147483648, %v813_v44 }
  0xc4   :  { %v346_v51 = vmul.f32 %v619_v37, %v345_v46  ;;  %630 = vrcp.f32 %v815_v48  ;;  %v397_v19 = vand.u32 2147483647, %v815_v48  ;;  %v399_v26 = vand.u32 2147483648, %v815_v48 }
  0xc5   :  { %v625_v52 = vpop.eup %624  ;;  %v332_v53 = vadd.f32 %v617_v36, %v331_v49  ;;  %vm378_vm14 = vweird.f32 %v813_v44  ;;  %vm383_vm0 = vcmp.eq.f32.partialorder %v382_v16, 8.507059e+37  ;;  %v385_v35 = vor.u32 1.1754944e-38, %v384_v17 }
  0xc6   :  { %v347_v55 = vadd.f32 %v619_v37, %v346_v51  ;;  %v359_v56 = vmul.f32 %v625_v52, %v324_v34  ;;  %v627_v57 = vpop.eup %626  ;;  %vm364_vm9 = vweird.f32 %v625_v52  ;;  %vm393_vm1 = vweird.f32 %v815_v48 }
  0xc7   :  { %v336_v58 = vsel %vm335_vm5, %v617_v36, %v332_v53  ;;  %v819_v1 = vadd.f32 1.0, %v627_v57  ;;  %vm365_vm11 = vmor %vm363_vm8, %vm364_vm9  ;;  %v400_v38 = vor.u32 1.1754944e-38, %v399_v26 }
  0xc8   :  { %v341_v62 = vsel %vm338_vm3, %v340_v54, %v336_v58  ;;  %v351_v63 = vsel %vm350_vm7, %v619_v37, %v347_v55  ;;  %v360_v0 = vsub.f32 1.0, %v359_v56  ;;  %vm398_vm3 = vcmp.eq.f32.partialorder %v397_v19, 8.507059e+37  ;;  %v255_v42 = vpop.f32.mrf.mxu3 }
  0xc9   :  { %v629_v2 = vpop.eup %628  ;;  %v418_v3 = vmul.f32 %v341_v62, %v795_v6  ;;  %v356_v4 = vsel %vm353_vm6, %v355_v59, %v351_v63  ;;  %632 = vrcp.f32 %v819_v1  ;;  %v370_v6 = vor.u32 1.1754944e-38, %v369_v61 }
  0xca   :  { %v631_v7 = vpop.eup %630  ;;  %v361_v8 = vmul.f32 %v625_v52, %v360_v0  ;;  %v374_v9 = vmul.f32 %v629_v2, %v813_v44  ;;  %v419_v11 = vmul.f32 %v356_v4, %v798_v10  ;;  %vm379_vm12 = vweird.f32 %v629_v2 }
  0xcb   :  { %v389_v13 = vmul.f32 %v631_v7, %v815_v48  ;;  %v424_v10 = vmul.f32 %v418_v3, %v252_v5  ;;  %vm394_vm13 = vweird.f32 %v631_v7  ;;  %vm380_vm15 = vmor %vm378_vm14, %vm379_vm12  ;;  %v414_v47 = vand.u32 2147483648, %v819_v1 }
  0xcc   :  { %v362_v14 = vadd.f32 %v625_v52, %v361_v8  ;;  %v375_v15 = vsub.f32 1.0, %v374_v9  ;;  %vm395_vm2 = vmor %vm393_vm1, %vm394_vm13  ;;  %v412_v50 = vand.u32 2147483647, %v819_v1  ;;  %vm408_vm5 = vweird.f32 %v819_v1 }
  0xcd   :  { %v390_v18 = vsub.f32 1.0, %v389_v13  ;;  %v275_v21 = vpop.f32.mrf.mxu0  ;;  %496 = vmatmul.f32.vlgmr.msrb.gmra.mxu2 %v424_v10 }
  0xce   :  { %v366_v22 = vsel %vm365_vm11, %v625_v52, %v362_v14  ;;  %v376_v23 = vmul.f32 %v629_v2, %v375_v15  ;;  %v425_v29 = vmul.f32 %v419_v11, %v275_v21  ;;  %v298_v30 = vpop.f32.mrf.mxu1  ;;  %vm413_vm7 = vcmp.eq.f32.partialorder %v412_v50, 8.507059e+37 }
  0xcf   :  { %v371_v27 = vsel %vm824_vm10, %v370_v6, %v366_v22  ;;  %v391_v28 = vmul.f32 %v631_v7, %v390_v18  ;;  %v633_v34 = vpop.eup %632 }
  0xd0   :  { %v420_v31 = vmul.f32 %v371_v27, %v801_v20  ;;  %v377_v32 = vadd.f32 %v629_v2, %v376_v23  ;;  %519 = vmatmul.f32.vlgmr.msrb.gmra.mxu3 %v425_v29  ;;  %v404_v39 = vmul.f32 %v633_v34, %v819_v1  ;;  %vm409_vm4 = vweird.f32 %v633_v34 }
  0xd1   :  { %v392_v36 = vadd.f32 %v631_v7, %v391_v28  ;;  %vm410_vm6 = vmor %vm408_vm5, %vm409_vm4 }
  0xd2   :  { %v381_v37 = vsel %vm380_vm15, %v629_v2, %v377_v32  ;;  %v426_v40 = vmul.f32 %v420_v31, %v298_v30  ;;  %v405_v45 = vsub.f32 1.0, %v404_v39 }
  0xd3   :  { %v386_v41 = vsel %vm383_vm0, %v385_v35, %v381_v37  ;;  %v396_v20 = vsel %vm395_vm2, %v631_v7, %v392_v36 }
  0xd4   :  { %v421_v43 = vmul.f32 %v386_v41, %v804_v24  ;;  %v401_v44 = vsel %vm398_vm3, %v400_v38, %v396_v20  ;;  %542 = vmatmul.f32.vlgmr.msra.gmra.mxu0 %v426_v40  ;;  %v406_v49 = vmul.f32 %v633_v34, %v405_v45  ;;  %v415_v24 = vor.u32 1.1754944e-38, %v414_v47 }
  0xd5   :  { %v422_v46 = vmul.f32 %v401_v44, %v806_v25  ;;  %v278_v48 = vpop.f32.mrf.mxu0 }
  0xd6   :  { %v427_v51 = vmul.f32 %v421_v43, %v255_v42  ;;  %v407_v53 = vadd.f32 %v633_v34, %v406_v49  ;;  %v301_v25 = vpop.f32.mrf.mxu1 }
  0xd7   :  { %v428_v52 = vmul.f32 %v422_v46, %v278_v48 }
  0xd8   :  { %499 = vmatmul.f32.gmra.mxu2 %v427_v51  ;;  %v411_v54 = vsel %vm410_vm6, %v633_v34, %v407_v53 }
  0xd9   :  { %522 = vmatmul.f32.gmra.mxu3 %v428_v52  ;;  %v416_v55 = vsel %vm413_vm7, %v415_v24, %v411_v54 }
  0xda   :  { %v423_v56 = vmul.f32 %v416_v55, %v810_v33 }
  0xdc   :  { %v429_v57 = vmul.f32 %v423_v56, %v301_v25 }
  0xde   :  { %545 = vmatmul.f32.vlgmr.msra.gmra.mxu1 %v429_v57 }
 0x150   :  { %v497_v58 = vpop.f32.mrf.mxu2 }
 0x151   :  { %v543_v61 = vpop.f32.mrf.mxu0 }
 0x153   :  { %v520_v59 = vpop.f32.mrf.mxu3 }
 0x154   :  { %v521_v60 = vadd.f32 %v520_v59, %v497_v58 }
 0x156   :  { %v544_v62 = vadd.f32 %v543_v61, %v521_v60 }
 0x158   :  { %558 = vst [vmem:[#allocation9] sm:$0xff] %v544_v62 }
 0x15b   :  { %v500_v63 = vpop.f32.mrf.mxu2  ;;  %v546_v2 = vpop.f32.mrf.mxu1 }
 0x15c   :  { %v523_v0 = vpop.f32.mrf.mxu3 }
 0x15d   :  { %v524_v1 = vadd.f32 %v523_v0, %v500_v63 }
 0x15f   :  { %v547_v3 = vadd.f32 %v546_v2, %v524_v1 }
 0x161   :  { %559 = vst [vmem:[#allocation9 + $0x8] sm:$0xff] %v547_v3 }
 0x162   :  { %572 = dma.vmem_to_hbm [thread:$0]  %s565_s29, 256, %s567_s5, [#allocation5], %s740_s24, %s740_s24, %s741_s25  }
 0x163   :  { %734 = dma.done.wait [#allocation5], 256  }
 0x164   :  { %735 = vsyncadd [#allocation5], 4294967040 }
 0x165   :  { %577 = vsyncpa [#allocation4], 1 }
 0x166   :  { %578 = vsyncpa [#allocation7], 1 }
 0x167   :  { %579 = vsyncpa [#allocation5], 1 }

</bundles_post_ra>
